<compile_context>
chip_gen: v6e
topology: v6e:2x2x1
jax: 0.10.0
libtpu: 0.0.40
codegen_flags: <defaults>
</compile_context>

<pallas_src>
import functools

import jax
import jax.numpy as jnp
from jax.experimental import pallas as pl
from jax.experimental.pallas import tpu as pltpu


# ---------------------------------------------------------------------------
# Tiled L2 penalty for LARGE parameters (memory-bound streaming reduction).
# ---------------------------------------------------------------------------
_TILE_LANES = 512          # lane-dense row width (multiple of 128)
_TILE_ROWS = 512           # 512x512 f32 tile = 1 MiB; rows % 16 == 0 (bf16 ok)
_SMALL_THRESHOLD = _TILE_ROWS * _TILE_LANES   # <= one tile -> fused jnp path
_BATCH_ROW_MAX = 16384     # rows bigger than this are routed out of the batch
_BATCH_STACK_BYTES = 4 * 1024 * 1024          # VMEM guard for the batched call


def _tiled_l2_kernel(n_rows, p_ref, o_ref):
    step = pl.program_id(0)
    p = p_ref[...].astype(jnp.float32)                         # (TR, LANES)
    rs = jnp.sum(p * p, axis=-1, keepdims=True)                # (TR, 1)
    # Mask rows past the end of the array (only the last, partial grid block
    # has such rows).  Masking after the per-row reduce is safe: rows stay
    # independent and jnp.where drops any garbage (even NaN/Inf) values.
    row_ids = step * _TILE_ROWS + jax.lax.broadcasted_iota(
        jnp.int32, (_TILE_ROWS, 1), 0)
    rs = jnp.where(row_ids < n_rows, rs, 0.0)
    part = jnp.sum(rs, axis=0, keepdims=True)                  # (1, 1)
    # One partial per grid step, broadcast into a native (8,128) tile so the
    # output block keeps full (8,128) layout; the wrapper reads [:, 0, 0].
    o_ref[...] = jnp.broadcast_to(part, (1, 8, 128))


def _tiled_l2_impl(p2d):
    n_rows, lanes = p2d.shape
    num_blocks = pl.cdiv(n_rows, _TILE_ROWS)
    partials = pl.pallas_call(
        functools.partial(_tiled_l2_kernel, n_rows),
        out_shape=jax.ShapeDtypeStruct((num_blocks, 8, 128), jnp.float32),
        grid_spec=pltpu.PrefetchScalarGridSpec(
            num_scalar_prefetch=0,
            grid=(num_blocks,),
            in_specs=[pl.BlockSpec((_TILE_ROWS, lanes), lambda i: (i, 0))],
            out_specs=pl.BlockSpec((1, 8, 128), lambda i: (i, 0, 0)),
        ),
        compiler_params=pltpu.CompilerParams(
            dimension_semantics=("parallel",),     # both TCs on v7x
            vmem_limit_bytes=32 * 1024 * 1024,     # safe on v5e/v6e/v7x
        ),
    )(p2d)
    return jnp.sum(partials[:, 0, 0])


def _l2_impl(p):
    pf = jnp.asarray(p)
    if pf.size <= _SMALL_THRESHOLD:
        # Tiny/medium parameter: fuse into the surrounding XLA loss graph.
        return jnp.sum(pf.astype(jnp.float32) ** 2)
    flat = pf.reshape(-1)                         # keep original dtype in HBM
    n_rows = flat.size // _TILE_LANES
    main = flat[: n_rows * _TILE_LANES].reshape(n_rows, _TILE_LANES)
    total = _tiled_l2_impl(main)
    rem = flat.size - n_rows * _TILE_LANES
    if rem:
        tail = flat[n_rows * _TILE_LANES:]        # < _TILE_LANES elements
        total = total + jnp.sum(tail.astype(jnp.float32) ** 2)
    return total


@jax.custom_vjp
def parameter_penalty(p):
    """Quadratic (L2) penalty: sum(p**2) as a 0-d float32."""
    return _l2_impl(p)


def _pp_fwd(p):
    return _l2_impl(p), p


def _pp_bwd(p, g):
    return ((2.0 * p.astype(jnp.float32) * g).astype(p.dtype),)


parameter_penalty.defvjp(_pp_fwd, _pp_bwd)


# ---------------------------------------------------------------------------
# Batched penalty kernel: N small parameter rows -> N scalar penalties.
# Vectorized: one square + one row-reduce over the whole (N, D_pad) block.
# ---------------------------------------------------------------------------
def _batched_l2_kernel(p_ref, o_ref):
    p = p_ref[...].astype(jnp.float32)                   # (N, D_pad)
    o_ref[...] = jnp.sum(p * p, axis=-1, keepdims=True)  # (N, 1) single store


def _batched_l2_impl(stacked):
    n, _ = stacked.shape
    out = pl.pallas_call(
        _batched_l2_kernel,
        out_shape=jax.ShapeDtypeStruct((n, 1), jnp.float32),
        compiler_params=pltpu.CompilerParams(
            vmem_limit_bytes=32 * 1024 * 1024),
    )(stacked)
    return out[:, 0]


@jax.custom_vjp
def batched_parameter_penalty(stacked):
    """sum(p**2) per row of an (N, D_pad) stack of (zero-padded) parameters."""
    return _batched_l2_impl(stacked)


def _batched_fwd(stacked):
    return _batched_l2_impl(stacked), stacked


def _batched_bwd(stacked, g):
    # Note: casting back to stacked.dtype drops precision for bf16 stacks
    # (expected: gradients live in the parameter dtype).
    g = g.astype(jnp.float32)[:, None]
    return ((2.0 * stacked.astype(jnp.float32) * g).astype(stacked.dtype),)


batched_parameter_penalty.defvjp(_batched_fwd, _batched_bwd)


# ---------------------------------------------------------------------------
# Module analogue + multi-condition fusion helper.
# ---------------------------------------------------------------------------
class ParameterCondition:
    """JAX/Pallas analogue of torchphysics ParameterCondition.

    forward() returns the (unweighted) penalty of the learnable parameter; the
    `weight` is applied by the trainer outside forward, as in PyTorch.
    """

    def __init__(self, parameter, penalty=None, weight=1.0,
                 name="parametercondition"):
        self.name = name
        self.weight = weight
        self.track_gradients = False
        self.parameter = parameter  # registered parameter (name + '_params')
        # TODO(synk): torchphysics accepts an arbitrary `penalty` callable on
        # parameter.coordinates; only the quadratic (L2) penalty is lowered to
        # Pallas here — any other callable runs as plain (fused) JAX.
        self.penalty = penalty

    def forward(self):
        if self.penalty is not None:
            return self.penalty(self.parameter)
        return parameter_penalty(self.parameter)


def fuse_parameter_conditions(conditions):
    """Evaluate the L2 penalties of many ParameterConditions in ONE launch.

    Small parameters are stacked into a single batched Pallas call; large ones
    (or conditions with a custom penalty) are routed to their own path.
    Returns {condition.name: 0-d float32 penalty}; weights stay with trainer.
    """
    results = {}
    small = []
    for c in conditions:
        if c.penalty is not None:
            results[c.name] = c.penalty(c.parameter)
        elif jnp.asarray(c.parameter).size > _BATCH_ROW_MAX:
            results[c.name] = parameter_penalty(c.parameter)   # tiled path
        else:
            small.append(c)
    if small:
        flats = [jnp.asarray(c.parameter).reshape(-1) for c in small]
        dtype = jnp.result_type(*flats)       # keep bf16 if everything is bf16
        d_max = max(f.size for f in flats)
        d_pad = max(128, ((d_max + 127) // 128) * 128)   # lane-aligned rows
        stacked = jnp.stack(
            [jnp.pad(f.astype(dtype), (0, d_pad - f.size)) for f in flats])
        if stacked.size * stacked.dtype.itemsize <= _BATCH_STACK_BYTES:
            losses = batched_parameter_penalty(stacked)   # one pallas_call
        else:
            # VMEM guard: stack too large to hold un-pipelined -> fused XLA.
            losses = jnp.sum(stacked.astype(jnp.float32) ** 2, axis=-1)
        for i, c in enumerate(small):
            results[c.name] = losses[i]
    return results


if __name__ == "__main__":
    key = jax.random.PRNGKey(0)
    k1, k2, k3, k4, k5 = jax.random.split(key, 5)

    # Small learnable parameters (torchphysics.Parameter style: (1, D) rows).
    p1 = jax.random.normal(k1, (1, 32), dtype=jnp.float32)
    p2 = jax.random.normal(k2, (1, 20), dtype=jnp.float32)
    p3 = jax.random.normal(k3, (1, 7), dtype=jnp.float32)
    # Large parameters exercise the tiled Pallas path; sizes are deliberately
    # NOT multiples of the tile (partial row-block + sub-row tail + masking).
    p_big = jax.random.normal(k4, (1, 333_333), dtype=jnp.float32)
    p_big_bf16 = jax.random.normal(
        k5, (523, 777), dtype=jnp.float32).astype(jnp.bfloat16)

    conds = [
        ParameterCondition(p1, weight=10.0, name="c1"),
        ParameterCondition(p2, weight=1.0, name="c2"),
        ParameterCondition(p3, weight=0.5, name="c3"),
        ParameterCondition(p_big, weight=1.0, name="big_f32"),
        ParameterCondition(p_big_bf16, weight=1.0, name="big_bf16"),
    ]
    params = {"c1": p1, "c2": p2, "c3": p3,
              "big_f32": p_big, "big_bf16": p_big_bf16}

    # 1) Per-condition forward: tiny params use the fused-XLA path, large ones
    #    use the parallel tiled Pallas reduction (bf16 streamed as bf16).
    for c in conds:
        loss = jax.block_until_ready(c.forward())
        ref = jnp.sum(params[c.name].astype(jnp.float32) ** 2)
        assert jnp.allclose(loss, ref, rtol=2e-5, atol=1e-2), (c.name, loss, ref)

    # 2) All conditions fused: small ones share ONE batched Pallas launch,
    #    large ones are routed to the tiled path.
    losses = fuse_parameter_conditions(conds)
    losses = {k: jax.block_until_ready(v) for k, v in losses.items()}
    for c in conds:
        ref = jnp.sum(params[c.name].astype(jnp.float32) ** 2)
        assert jnp.allclose(losses[c.name], ref, rtol=2e-5, atol=1e-2), c.name

    # 3) Gradient through the batched kernel (custom VJP).
    stacked = jnp.stack([jnp.pad(p.reshape(-1), (0, 128 - p.size))
                         for p in (p1, p2, p3)])
    grad = jax.block_until_ready(
        jax.grad(lambda s: jnp.sum(batched_parameter_penalty(s)))(stacked))
    assert jnp.allclose(grad, 2.0 * stacked, rtol=1e-6, atol=1e-6)

    # 4) Gradient through the large-parameter (tiled Pallas) path.
    grad_big = jax.block_until_ready(jax.grad(parameter_penalty)(p_big))
    assert jnp.allclose(grad_big, 2.0 * p_big, rtol=1e-6, atol=1e-6)
    grad_bf16 = jax.block_until_ready(jax.grad(parameter_penalty)(p_big_bf16))
    ref_bf16 = (2.0 * p_big_bf16.astype(jnp.float32)).astype(jnp.bfloat16)
    assert jnp.allclose(grad_bf16.astype(jnp.float32),
                        ref_bf16.astype(jnp.float32), rtol=1e-6, atol=1e-6)

    print("KERNEL_OK")
</pallas_src>

<mosaic_0001>
module attributes {stable_mosaic.version = 11 : i64} {
  func.func @_tiled_l2_kernel(%arg0: i32, %arg1: memref<512x512xf32, #tpu.memory_space<vmem>>, %arg2: memref<1x8x128xf32, #tpu.memory_space<vmem>>) attributes {dimension_semantics = [#tpu.dimension_semantics<parallel>], iteration_bounds = array<i64: 2>, scalar_prefetch = 0 : i64, scratch_operands = 0 : i64, tpu.core_type = #tpu.core_type<tc>, window_params = [{transform_indices = @transform_0, window_bounds = array<i64: 512, 512>}, {transform_indices = @transform_1, window_bounds = array<i64: 1, 8, 128>}]} {
    %c0 = arith.constant 0 : index
    %c0_0 = arith.constant 0 : index
    %0 = vector.load %arg1[%c0, %c0_0] : memref<512x512xf32, #tpu.memory_space<vmem>>, vector<512x512xf32>
    %1 = arith.mulf %0, %0 : vector<512x512xf32>
    %cst = arith.constant dense<0.000000e+00> : vector<512xf32>
    %2 = vector.multi_reduction <add>, %1, %cst [1] : vector<512x512xf32> to vector<512xf32>
    %3 = vector.shape_cast %2 : vector<512xf32> to vector<512x1xf32>
    %c512_i32 = arith.constant 512 : i32
    %4 = arith.muli %arg0, %c512_i32 : i32
    %5 = tpu.iota {dimensions = array<i32: 0>} : vector<512x1xi32>
    %6 = vector.broadcast %4 : i32 to vector<512x1xi32>
    %7 = arith.addi %6, %5 : vector<512x1xi32>
    %c651_i32 = arith.constant 651 : i32
    %8 = vector.broadcast %c651_i32 : i32 to vector<512x1xi32>
    %9 = arith.cmpi slt, %7, %8 : vector<512x1xi32>
    %cst_1 = arith.constant 0.000000e+00 : f32
    %10 = vector.broadcast %cst_1 : f32 to vector<512x1xf32>
    %11 = arith.select %9, %3, %10 : vector<512x1xi1>, vector<512x1xf32>
    %cst_2 = arith.constant dense<0.000000e+00> : vector<1xf32>
    %12 = vector.multi_reduction <add>, %11, %cst_2 [0] : vector<512x1xf32> to vector<1xf32>
    %13 = vector.shape_cast %12 : vector<1xf32> to vector<1x1xf32>
    %14 = vector.shape_cast %13 : vector<1x1xf32> to vector<1x1x1xf32>
    %15 = vector.broadcast %14 : vector<1x1x1xf32> to vector<1x8x128xf32>
    %c0_3 = arith.constant 0 : index
    %c0_4 = arith.constant 0 : index
    %c0_5 = arith.constant 0 : index
    %16 = vector.load %arg2[%c0_3, %c0_4, %c0_5] : memref<1x8x128xf32, #tpu.memory_space<vmem>>, vector<1x8x128xf32>
    tpu.vector_store %arg2[%c0_3, %c0_4, %c0_5], %15 {strides = array<i32>} : memref<1x8x128xf32, #tpu.memory_space<vmem>>, vector<1x8x128xf32>,
    return
  }
  func.func @transform_0(%arg0: i32) -> (i32, i32) {
    %c0_i32 = arith.constant 0 : i32
    %c0_i32_0 = arith.constant 0 : i32
    return %arg0, %c0_i32 : i32, i32
  }
  func.func @transform_1(%arg0: i32) -> (i32, i32, i32) {
    %c0_i32 = arith.constant 0 : i32
    %c0_i32_0 = arith.constant 0 : i32
    %c0_i32_1 = arith.constant 0 : i32
    return %arg0, %c0_i32, %c0_i32_0 : i32, i32, i32
  }
}

</mosaic_0001>

<bundles_post_ra>
// kernel: tpu_custom_call.1
= control target key start
LH: loop header
LB: loop body
LE: loop exit
PB: predicated region body
PF: predicated region fallthrough
CT: control target
= control target key end

     0   :  { %6 = vsyncpa [#allocation3], 0  ;;  %s2209_s0 = inlined_call_operand.hbm [shape: f32[651,512], index: 0, kind: input, shape index: {}]   ;;  %s2210_s1 = inlined_call_operand.hbm [shape: f32[2,8,128], index: 1, kind: output, shape index: {}]  }
   0x1   :  { %8 = vsyncpa [#allocation3 + $0x1], 0 }
   0x2   :  { %9 = vsyncpa [#allocation4], 0 }
   0x3   :  { %11 = vsyncpa [#allocation4 + $0x1], 0  ;;  %s1565_s6 = smov 0   ;;  %s1567_s7 = smov 0  }
   0x4   :  { %s1569_s8 = smov 0   ;;  %s1571_s9 = smov 0  }
   0x5 LB: > { %s1586_s10 = sadd.s32 4294967295, %s1549_s9   ;;  %s1394_s11 = sadd.s32 4294967294, %s1549_s9   ;;  %s1549_s9 = sphi %s1571_s9, %s2220_s9   ;;  %s1545_s8 = sphi %s1569_s8, %s2219_s8   ;;  %s1541_s7 = sphi %s1567_s7, %s2218_s7   ;;  %s1537_s6 = sphi %s1565_s6, %s2217_s6  }
   0x6   : > { %s1590_s12 = sadd.s32 1, %s1549_s9   ;;  %s24_s13 = sadd.s32 1, %s1545_s8 }
   0x7   : > { %s21_s14 = ssub.s32 %s1549_s9, %s1590_s12  ;;  %p31_p0 = scmp.ne.s32.totalorder %s1545_s8, %s1541_s7 }
   0x8   : > { %p22_p1 = scmp.eq.s32.totalorder %s21_s14, 0  ;;  %p32_p2 = scmp.eq.s32.totalorder %s1549_s9, 0 }
   0x9   : > { %p37_p3 = scmp.ne.s32.totalorder %s1541_s7, %s1537_s6  ;;  %p38_p4 = scmp.eq.s32.totalorder %s1586_s10, 0 }
   0xa   : > { %s1602_s15 = scalar_select %p22_p1, %s1545_s8, %s24_s13  }
   0xb   : > { %p33_p5 = por %p32_p2, %p31_p0  ;;  %p1604_p6 = por %p38_p4, %p37_p3 }
   0xc   : > { %p61_p7 = scmp.eq.s32.totalorder %s1586_s10, 1  ;;  %p67_p8 = scmp.eq.s32.totalorder %s1394_s11, 1 }
   0xd   : > { %p2211_p11 = scmp.ge.s32.totalorder %s1549_s9, 2 }
   0xe   : > { %p1609_p9 = por %p61_p7, %p31_p0  ;;  %p1613_p10 = por %p67_p8, %p37_p3 }
   0xf   : > { %83 = sbr.rel (%p2211_p11) target bundleno = 52 (0x34), region = 16 }
  0x10   : > { %s2214_s18 = scalar_select %p1613_p10, 1, 0 }
  0x14   : > { %86 = sbr.rel (!%p33_p5) target bundleno = 52 (0x34), region = 20  ;;  %s87_s19 = sand.u32 (%p33_p5), 1, %s1545_s8  }
  0x15   : > { %s1398_s20 = sshll.u32 (%p33_p5), %s1549_s9, 6  ;;  %s1397_s21 = sshll.u32 (%p33_p5), %s87_s19, 11 }
  0x16   : > { %s93_s22 = ssub.s32 (%p33_p5), 82, %s1398_s20  ;;  %s1625_s25 = scalar_lea.sflag (%p33_p5), [#allocation3], %s87_s19 }
  0x17   : > { %p94_p12 = scmp.lt.s32.totalorder (%p33_p5), %s93_s22, 64  ;;  %s91_s26 = scalar_lea.vmem (%p33_p5), [#allocation2], %s1397_s21 }
  0x19   : > { %s2222_s22 = smov (!%p94_p12, %s93_s22), 64 }
  0x1a   : > { %s1622_s23 = sshll.u32 %s2222_s22, 9 }
  0x1b   : > { %s99_s24 = ssub.s32 32768, %s1622_s23 }
  0x1c   : > { %100 = vsyncadd %s1625_s25, %s99_s24  ;;  %p1401_p13 = scmp.ne.s32.totalorder %s1622_s23, 0  ;;  %s1416_s27 = sshll.u32 %s1549_s9, 15 }
  0x1d   : > { %s1633_s30 = scalar_lea.hbm %s2209_s0, %s1416_s27  ;;  %s106_s2 = sshll.u32 %s91_s26, 4  ;;  %s1635_s2 = int_to_ptr.vmem [resolvable:$true] %s106_s2 }
  0x1e   : > { %s1459_s3 = scalar_lea.hbm %s1633_s30, %s1622_s23  ;;  %s1463_s11 = scalar_lea.hbm %s2209_s0, 41984 }
  0x1f   : > { %p1460_p0 = scmp.ne.s32.totalorder %s1633_s30, %s1459_s3  ;;  %p1464_p3 = scmp.lt.s32.totalorder %s1633_s30, %s2209_s0 }
  0x20   : > { %p1465_p4 = scmp.lt.s32.totalorder %s1463_s11, %s1459_s3 }
  0x21   : > { %p1461_p1 = pnand %p1460_p0, %p1401_p13 }
  0x22   : > { %p1466_p5 = por %p1465_p4, %p1464_p3 }
  0x23   : > { %p1462_p2 = pneg %p1461_p1 }
  0x25   : > { %p1467_p7 = pnand %p1466_p5, %p1462_p2 }
  0x27   : > { %1470 = shalt.err (!%p1467_p7)
}
  0x28   : > { %s1471_s19 = scalar_lea.vmem %s1635_s2, %s1622_s23  ;;  %s1551_s20 = smov [#allocation2]  }
  0x29   : > { %p1472_p8 = scmp.ne.s32.totalorder %s1635_s2, %s1471_s19  ;;  %s1475_s21 = sshll.u32 %s1551_s20, 4  ;;  %s1476_s21 = int_to_ptr.vmem [resolvable:$false] %s1475_s21 }
  0x2a   : > { %s1477_s22 = scalar_lea.vmem %s1476_s21, 65536  ;;  %p1478_p1 = scmp.lt.s32.totalorder %s1635_s2, %s1476_s21 }
  0x2b   : > { %p1473_p12 = pnand %p1472_p8, %p1401_p13  ;;  %p1479_p11 = scmp.lt.s32.totalorder %s1477_s22, %s1471_s19 }
  0x2d   : > { %p1474_p0 = pneg %p1473_p12  ;;  %p1480_p10 = por %p1479_p11, %p1478_p1 }
  0x2f   : > { %p1481_p3 = pnand %p1480_p10, %p1474_p0 }
  0x31   : > { %1484 = shalt.err (!%p1481_p3)
}
  0x32   : > { %s1552_s24 = smov 512   ;;  %s1553_s26 = smov 32  }
  0x33   : > { %112 = dma.hbm_to_vmem [thread:$0]  (%p1401_p13), %s1633_s30, %s1622_s23, %s1635_s2, %s1625_s25, %s1552_s24, %s1552_s24, %s1553_s26  }
  0x34 PF: > { %p1406_p2 = scmp.ge.s32.totalorder %s1549_s9, 1  ;;  %p114_p4 = scmp.lt.s32.totalorder %s1549_s9, 3 }
  0x36   : > { %p115_p5 = pnand %p1406_p2, %p114_p4 }
  0x37   : > { %s1664_s27 = sand.u32 (!%p115_p5), 1, %s1541_s7  }
  0x38   : > { %118 = sbr.rel (%p115_p5) target bundleno = 365 (0x16d), region = 24  ;;  %s1407_s28 = sshll.u32 (!%p115_p5), %s1664_s27, 11 }
  0x39   : > { %s121_s29 = scalar_lea.sflag (!%p115_p5), [#allocation3], %s1664_s27  ;;  %s1668_s3 = scalar_lea.vmem (!%p115_p5), [#allocation2], %s1407_s28 }
  0x3d   : > { %1528 = dma.done.wait (%p1604_p6), %s121_s29, 32768  }
  0x3e   : > { %1530 = vsyncadd (%p1604_p6), %s121_s29, 4294934528  ;;  %v149_v0 = vld [vmem:[%s1668_s3] sm:$0xff]  ;;  %v150_v1 = vld [vmem:[%s1668_s3 + $0x8] sm:$0xff]  ;;  %s1409_s16 = sshll.u32 %s1586_s10, 9  ;;  %s1408_s23 = sshll.u32 %s1664_s27, 3 }
  0x3f   : > { %v151_v2 = vld [vmem:[%s1668_s3 + $0x10] sm:$0xff]  ;;  %v152_v3 = vld [vmem:[%s1668_s3 + $0x18] sm:$0xff]  ;;  %v405_v4 = vmul.f32 %v149_v0, %v149_v0  ;;  %v406_v5 = vmul.f32 %v150_v1, %v150_v1  ;;  %v157_v7 = vld [vmem:[%s1668_s3 + $0x40] sm:$0xff]  ;;  %s1411_s25 = sshll.u32 %s1586_s10, 7  ;;  %s142_s30 = scalar_lea.vmem [#allocation5], %s1408_s23 }
  0x40   : > { %v407_v6 = vmul.f32 %v151_v2, %v151_v2  ;;  %v158_v8 = vld [vmem:[%s1668_s3 + $0x48] sm:$0xff]  ;;  %v408_v9 = vmul.f32 %v152_v3, %v152_v3  ;;  %v159_v10 = vld [vmem:[%s1668_s3 + $0x50] sm:$0xff]  ;;  %v160_v11 = vld [vmem:[%s1668_s3 + $0x58] sm:$0xff]  ;;  %v413_v12 = vmul.f32 %v157_v7, %v157_v7  ;;  %s1324_s2 = sshll.u32 %s142_s30, 4  ;;  %s1322_s11 = scalar_lea.hbm %s2210_s1, %s1411_s25  ;;  %s1325_s2 = int_to_ptr.vmem [resolvable:$true] %s1324_s2 }
  0x41   : > { %v414_v13 = vmul.f32 %v158_v8, %v158_v8  ;;  %v153_v14 = vld [vmem:[%s1668_s3 + $0x20] sm:$0xff]  ;;  %v661_v15 = vadd.f32 %v406_v5, %v405_v4  ;;  %v415_v16 = vmul.f32 %v159_v10, %v159_v10  ;;  %v416_v17 = vmul.f32 %v160_v11, %v160_v11  ;;  %v154_v18 = vld [vmem:[%s1668_s3 + $0x28] sm:$0xff]  ;;  %v155_v19 = vld [vmem:[%s1668_s3 + $0x30] sm:$0xff]  ;;  %s1311_s13 = scalar_lea.sflag [#allocation4], %s1664_s27  ;;  %s1485_s14 = scalar_lea.vmem %s1325_s2, 128 }
  0x42   : > { %v156_v20 = vld [vmem:[%s1668_s3 + $0x38] sm:$0xff]  ;;  %v409_v21 = vmul.f32 %v153_v14, %v153_v14  ;;  %v410_v23 = vmul.f32 %v154_v18, %v154_v18  ;;  %v411_v24 = vmul.f32 %v155_v19, %v155_v19  ;;  %v161_v26 = vld [vmem:[%s1668_s3 + $0x60] sm:$0xff]  ;;  %v162_v27 = vld [vmem:[%s1668_s3 + $0x68] sm:$0xff]  ;;  %p1486_p6 = scmp.ne.s32.totalorder %s1325_s2, %s1485_s14  ;;  %s1554_s19 = smov [#allocation5]  }
  0x43   : > { %v671_v22 = vadd.f32 %v414_v13, %v413_v12  ;;  %v412_v25 = vmul.f32 %v156_v20, %v156_v20  ;;  %v163_v28 = vld [vmem:[%s1668_s3 + $0x70] sm:$0xff]  ;;  %v662_v29 = vadd.f32 %v661_v15, %v407_v6  ;;  %v164_v30 = vld [vmem:[%s1668_s3 + $0x78] sm:$0xff]  ;;  %v417_v31 = vmul.f32 %v161_v26, %v161_v26  ;;  %v165_v34 = vld [vmem:[%s1668_s3 + $0x80] sm:$0xff]  ;;  %s1489_s20 = sshll.u32 %s1554_s19, 4  ;;  %s1490_s20 = int_to_ptr.vmem [resolvable:$false] %s1489_s20 }
  0x44   : > { %v418_v32 = vmul.f32 %v162_v27, %v162_v27  ;;  %v419_v33 = vmul.f32 %v163_v28, %v163_v28  ;;  %v166_v35 = vld [vmem:[%s1668_s3 + $0x88] sm:$0xff]  ;;  %v666_v37 = vadd.f32 %v410_v23, %v409_v21  ;;  %v420_v38 = vmul.f32 %v164_v30, %v164_v30  ;;  %v167_v39 = vld [vmem:[%s1668_s3 + $0x90] sm:$0xff]  ;;  %v168_v40 = vld [vmem:[%s1668_s3 + $0x98] sm:$0xff]  ;;  %p1487_p10 = pnand %p1486_p6, %p1609_p9  ;;  %s1491_s10 = scalar_lea.vmem %s1490_s20, 256 }
  0x45   : > { %v672_v36 = vadd.f32 %v671_v22, %v415_v16  ;;  %v421_v41 = vmul.f32 %v165_v34, %v165_v34  ;;  %v169_v42 = vld [vmem:[%s1668_s3 + $0xa0] sm:$0xff]  ;;  %v663_v43 = vadd.f32 %v662_v29, %v408_v9  ;;  %v422_v45 = vmul.f32 %v166_v35, %v166_v35  ;;  %v170_v47 = vld [vmem:[%s1668_s3 + $0xa8] sm:$0xff]  ;;  %v171_v48 = vld [vmem:[%s1668_s3 + $0xb0] sm:$0xff]  ;;  %p1492_p13 = scmp.lt.s32.totalorder %s1325_s2, %s1490_s20  ;;  %p1493_p7 = scmp.lt.s32.totalorder %s1491_s10, %s1485_s14 }
  0x46   : > { %v676_v44 = vadd.f32 %v418_v32, %v417_v31  ;;  %v423_v46 = vmul.f32 %v167_v39, %v167_v39  ;;  %v172_v49 = vld [vmem:[%s1668_s3 + $0xb8] sm:$0xff]  ;;  %v667_v51 = vadd.f32 %v666_v37, %v411_v24  ;;  %v424_v52 = vmul.f32 %v168_v40, %v168_v40  ;;  %v173_v54 = vld [vmem:[%s1668_s3 + $0xc0] sm:$0xff]  ;;  %v174_v55 = vld [vmem:[%s1668_s3 + $0xc8] sm:$0xff]  ;;  %p1488_p11 = pneg %p1487_p10 }
  0x47   : > { %v673_v50 = vadd.f32 %v672_v36, %v416_v17  ;;  %v425_v53 = vmul.f32 %v169_v42, %v169_v42  ;;  %v175_v56 = vld [vmem:[%s1668_s3 + $0xd0] sm:$0xff]  ;;  %664 = vadd.xlane.f32.xlu0 %v663_v43  ;;  %v681_v58 = vadd.f32 %v422_v45, %v421_v41  ;;  %v426_v59 = vmul.f32 %v170_v47, %v170_v47  ;;  %v176_v61 = vld [vmem:[%s1668_s3 + $0xd8] sm:$0xff]  ;;  %v177_v62 = vld [vmem:[%s1668_s3 + $0xe0] sm:$0xff]  ;;  %p1494_p8 = por %p1493_p7, %p1492_p13 }
  0x48   : > { %v677_v57 = vadd.f32 %v676_v44, %v419_v33  ;;  %v427_v60 = vmul.f32 %v171_v48, %v171_v48  ;;  %v178_v63 = vld [vmem:[%s1668_s3 + $0xe8] sm:$0xff]  ;;  %v668_v0 = vadd.f32 %v667_v51, %v412_v25  ;;  %v428_v1 = vmul.f32 %v172_v49, %v172_v49  ;;  %v179_v4 = vld [vmem:[%s1668_s3 + $0xf0] sm:$0xff]  ;;  %v180_v5 = vld [vmem:[%s1668_s3 + $0xf8] sm:$0xff] }
  0x49   : > { %674 = vadd.xlane.f32.xlu1 %v673_v50  ;;  %v429_v2 = vmul.f32 %v173_v54, %v173_v54  ;;  %v430_v3 = vmul.f32 %v174_v55, %v174_v55  ;;  %v682_v7 = vadd.f32 %v681_v58, %v423_v46  ;;  %v686_v8 = vadd.f32 %v426_v59, %v425_v53  ;;  %v181_v10 = vld [vmem:[%s1668_s3 + $0x100] sm:$0xff]  ;;  %v182_v11 = vld [vmem:[%s1668_s3 + $0x108] sm:$0xff]  ;;  %v183_v16 = vld [vmem:[%s1668_s3 + $0x110] sm:$0xff]  ;;  %p1495_p12 = pnand %p1494_p8, %p1488_p11 }
  0x4a   : > { %v678_v6 = vadd.f32 %v677_v57, %v420_v38  ;;  %v431_v9 = vmul.f32 %v175_v56, %v175_v56  ;;  %v432_v12 = vmul.f32 %v176_v61, %v176_v61  ;;  %v433_v14 = vmul.f32 %v177_v62, %v177_v62  ;;  %v184_v17 = vld [vmem:[%s1668_s3 + $0x118] sm:$0xff]  ;;  %v185_v18 = vld [vmem:[%s1668_s3 + $0x120] sm:$0xff]  ;;  %v186_v23 = vld [vmem:[%s1668_s3 + $0x128] sm:$0xff] }
  0x4b   : > { %v691_v13 = vadd.f32 %v430_v3, %v429_v2  ;;  %v434_v15 = vmul.f32 %v178_v63, %v178_v63  ;;  %669 = vadd.xlane.f32.xlu0 %v668_v0  ;;  %v683_v19 = vadd.f32 %v682_v7, %v424_v52  ;;  %v687_v20 = vadd.f32 %v686_v8, %v427_v60  ;;  %v187_v24 = vld [vmem:[%s1668_s3 + $0x130] sm:$0xff]  ;;  %v188_v29 = vld [vmem:[%s1668_s3 + $0x138] sm:$0xff]  ;;  %v189_v30 = vld [vmem:[%s1668_s3 + $0x140] sm:$0xff] }
  0x4c   : > { %v435_v21 = vmul.f32 %v179_v4, %v179_v4  ;;  %v436_v22 = vmul.f32 %v180_v5, %v180_v5  ;;  %v437_v27 = vmul.f32 %v181_v10, %v181_v10  ;;  %v438_v28 = vmul.f32 %v182_v11, %v182_v11  ;;  %v190_v31 = vld [vmem:[%s1668_s3 + $0x148] sm:$0xff]  ;;  %v191_v36 = vld [vmem:[%s1668_s3 + $0x150] sm:$0xff]  ;;  %v193_v41 = vld [vmem:[%s1668_s3 + $0x160] sm:$0xff] }
  0x4d   : > { %679 = vadd.xlane.f32.xlu1 %v678_v6  ;;  %v692_v25 = vadd.f32 %v691_v13, %v431_v9  ;;  %v696_v26 = vadd.f32 %v434_v15, %v433_v14  ;;  %v688_v32 = vadd.f32 %v687_v20, %v428_v1  ;;  %v439_v33 = vmul.f32 %v183_v16, %v183_v16  ;;  %v194_v42 = vld [vmem:[%s1668_s3 + $0x168] sm:$0xff]  ;;  %v192_v45 = vld [vmem:[%s1668_s3 + $0x158] sm:$0xff]  ;;  %v195_v48 = vld [vmem:[%s1668_s3 + $0x170] sm:$0xff] }
  0x4e   : > { %v440_v34 = vmul.f32 %v184_v17, %v184_v17  ;;  %v441_v35 = vmul.f32 %v185_v18, %v185_v18  ;;  %v701_v39 = vadd.f32 %v438_v28, %v437_v27  ;;  %v442_v40 = vmul.f32 %v186_v23, %v186_v23  ;;  %v197_v53 = vld [vmem:[%s1668_s3 + $0x180] sm:$0xff]  ;;  %v198_v54 = vld [vmem:[%s1668_s3 + $0x188] sm:$0xff]  ;;  %v196_v56 = vld [vmem:[%s1668_s3 + $0x178] sm:$0xff] }
  0x4f   : > { %v693_v37 = vadd.f32 %v692_v25, %v432_v12  ;;  %v697_v38 = vadd.f32 %v696_v26, %v435_v21  ;;  %684 = vadd.xlane.f32.xlu0 %v683_v19  ;;  %v443_v43 = vmul.f32 %v187_v24, %v187_v24  ;;  %v444_v44 = vmul.f32 %v188_v29, %v188_v29  ;;  %v199_v59 = vld [vmem:[%s1668_s3 + $0x190] sm:$0xff]  ;;  %v201_v60 = vld [vmem:[%s1668_s3 + $0x1a0] sm:$0xff]  ;;  %v200_v1 = vld [vmem:[%s1668_s3 + $0x198] sm:$0xff] }
  0x50   : > { %v445_v46 = vmul.f32 %v189_v30, %v189_v30  ;;  %v446_v47 = vmul.f32 %v190_v31, %v190_v31  ;;  %v702_v50 = vadd.f32 %v701_v39, %v439_v33  ;;  %v706_v51 = vadd.f32 %v442_v40, %v441_v35  ;;  %v202_v2 = vld [vmem:[%s1668_s3 + $0x1a8] sm:$0xff]  ;;  %v203_v7 = vld [vmem:[%s1668_s3 + $0x1b0] sm:$0xff]  ;;  %v205_v8 = vld [vmem:[%s1668_s3 + $0x1c0] sm:$0xff] }
  0x51   : > { %689 = vadd.xlane.f32.xlu1 %v688_v32  ;;  %v698_v49 = vadd.f32 %v697_v38, %v436_v22  ;;  %v447_v52 = vmul.f32 %v191_v36, %v191_v36  ;;  %v449_v57 = vmul.f32 %v193_v41, %v193_v41  ;;  %v450_v58 = vmul.f32 %v194_v42, %v194_v42  ;;  %v206_v9 = vld [vmem:[%s1668_s3 + $0x1c8] sm:$0xff]  ;;  %v204_v13 = vld [vmem:[%s1668_s3 + $0x1b8] sm:$0xff]  ;;  %v207_v15 = vld [vmem:[%s1668_s3 + $0x1d0] sm:$0xff] }
  0x52   : > { %v711_v55 = vadd.f32 %v446_v47, %v445_v46  ;;  %v703_v61 = vadd.f32 %v702_v50, %v440_v34  ;;  %v707_v62 = vadd.f32 %v706_v51, %v443_v43  ;;  %v448_v63 = vmul.f32 %v192_v45, %v192_v45  ;;  %v209_v20 = vld [vmem:[%s1668_s3 + $0x1e0] sm:$0xff]  ;;  %v210_v21 = vld [vmem:[%s1668_s3 + $0x1e8] sm:$0xff]  ;;  %v208_v24 = vld [vmem:[%s1668_s3 + $0x1d8] sm:$0xff] }
  0x53   : > { %v451_v0 = vmul.f32 %v195_v48, %v195_v48  ;;  %694 = vadd.xlane.f32.xlu0 %v693_v37  ;;  %v716_v4 = vadd.f32 %v450_v58, %v449_v57  ;;  %v453_v5 = vmul.f32 %v197_v53, %v197_v53  ;;  %v454_v6 = vmul.f32 %v198_v54, %v198_v54  ;;  %v211_v27 = vld [vmem:[%s1668_s3 + $0x1f0] sm:$0xff]  ;;  %v213_v32 = vld [vmem:[%s1668_s3 + $0x200] sm:$0xff]  ;;  %v214_v33 = vld [vmem:[%s1668_s3 + $0x208] sm:$0xff] }
  0x54   : > { %v712_v3 = vadd.f32 %v711_v55, %v447_v52  ;;  %v708_v10 = vadd.f32 %v707_v62, %v444_v44  ;;  %v452_v11 = vmul.f32 %v196_v56, %v196_v56  ;;  %v455_v12 = vmul.f32 %v199_v59, %v199_v59  ;;  %v212_v36 = vld [vmem:[%s1668_s3 + $0x1f8] sm:$0xff]  ;;  %v215_v39 = vld [vmem:[%s1668_s3 + $0x210] sm:$0xff]  ;;  %v217_v40 = vld [vmem:[%s1668_s3 + $0x220] sm:$0xff] }
  0x55   : > { %699 = vadd.xlane.f32.xlu1 %v698_v49  ;;  %v457_v14 = vmul.f32 %v201_v60, %v201_v60  ;;  %v717_v16 = vadd.f32 %v716_v4, %v451_v0  ;;  %v456_v17 = vmul.f32 %v200_v1, %v200_v1  ;;  %v721_v18 = vadd.f32 %v454_v6, %v453_v5  ;;  %v218_v44 = vld [vmem:[%s1668_s3 + $0x228] sm:$0xff]  ;;  %v219_v49 = vld [vmem:[%s1668_s3 + $0x230] sm:$0xff]  ;;  %v221_v50 = vld [vmem:[%s1668_s3 + $0x240] sm:$0xff] }
  0x56   : > { %v458_v19 = vmul.f32 %v202_v2, %v202_v2  ;;  %v713_v22 = vadd.f32 %v712_v3, %v448_v63  ;;  %v459_v23 = vmul.f32 %v203_v7, %v203_v7  ;;  %v461_v25 = vmul.f32 %v205_v8, %v205_v8  ;;  %v222_v51 = vld [vmem:[%s1668_s3 + $0x248] sm:$0xff]  ;;  %v216_v54 = vld [vmem:[%s1668_s3 + $0x218] sm:$0xff]  ;;  %v225_v62 = vld [vmem:[%s1668_s3 + $0x260] sm:$0xff] }
  0x57   : > { %v462_v26 = vmul.f32 %v206_v9, %v206_v9  ;;  %704 = vadd.xlane.f32.xlu0 %v703_v61  ;;  %v722_v28 = vadd.f32 %v721_v18, %v455_v12  ;;  %v460_v29 = vmul.f32 %v204_v13, %v204_v13  ;;  %v463_v31 = vmul.f32 %v207_v15, %v207_v15  ;;  %v223_v61 = vld [vmem:[%s1668_s3 + $0x250] sm:$0xff]  ;;  %v226_v63 = vld [vmem:[%s1668_s3 + $0x268] sm:$0xff]  ;;  %v220_v0 = vld [vmem:[%s1668_s3 + $0x238] sm:$0xff] }
  0x58   : > { %v726_v30 = vadd.f32 %v458_v19, %v457_v14  ;;  %v718_v34 = vadd.f32 %v717_v16, %v452_v11  ;;  %v465_v37 = vmul.f32 %v209_v20, %v209_v20  ;;  %v466_v38 = vmul.f32 %v210_v21, %v210_v21  ;;  %v227_v4 = vld [vmem:[%s1668_s3 + $0x270] sm:$0xff]  ;;  %v224_v9 = vld [vmem:[%s1668_s3 + $0x258] sm:$0xff]  ;;  %v230_v11 = vld [vmem:[%s1668_s3 + $0x288] sm:$0xff] }
  0x59   : > { %709 = vadd.xlane.f32.xlu1 %v708_v10  ;;  %v731_v35 = vadd.f32 %v462_v26, %v461_v25  ;;  %v464_v42 = vmul.f32 %v208_v24, %v208_v24  ;;  %v467_v43 = vmul.f32 %v211_v27, %v211_v27  ;;  %v469_v47 = vmul.f32 %v213_v32, %v213_v32  ;;  %v229_v10 = vld [vmem:[%s1668_s3 + $0x280] sm:$0xff]  ;;  %v228_v14 = vld [vmem:[%s1668_s3 + $0x278] sm:$0xff] }
  0x5a   : > { %v727_v41 = vadd.f32 %v726_v30, %v459_v23  ;;  %v736_v46 = vadd.f32 %v466_v38, %v465_v37  ;;  %v470_v48 = vmul.f32 %v214_v33, %v214_v33  ;;  %v723_v52 = vadd.f32 %v722_v28, %v456_v17  ;;  %v231_v17 = vld [vmem:[%s1668_s3 + $0x290] sm:$0xff]  ;;  %v233_v18 = vld [vmem:[%s1668_s3 + $0x2a0] sm:$0xff]  ;;  %v234_v23 = vld [vmem:[%s1668_s3 + $0x2a8] sm:$0xff] }
  0x5b   : > { %v732_v45 = vadd.f32 %v731_v35, %v463_v31  ;;  %714 = vadd.xlane.f32.xlu0 %v713_v22  ;;  %v468_v53 = vmul.f32 %v212_v36, %v212_v36  ;;  %v471_v55 = vmul.f32 %v215_v39, %v215_v39  ;;  %v473_v56 = vmul.f32 %v217_v40, %v217_v40  ;;  %v235_v28 = vld [vmem:[%s1668_s3 + $0x2b0] sm:$0xff]  ;;  %v238_v30 = vld [vmem:[%s1668_s3 + $0x2c8] sm:$0xff]  ;;  %v232_v33 = vld [vmem:[%s1668_s3 + $0x298] sm:$0xff] }
  0x5c   : > { %v728_v57 = vadd.f32 %v727_v41, %v460_v29  ;;  %v737_v58 = vadd.f32 %v736_v46, %v467_v43  ;;  %v741_v59 = vadd.f32 %v470_v48, %v469_v47  ;;  %v474_v60 = vmul.f32 %v218_v44, %v218_v44  ;;  %v237_v29 = vld [vmem:[%s1668_s3 + $0x2c0] sm:$0xff]  ;;  %v239_v36 = vld [vmem:[%s1668_s3 + $0x2d0] sm:$0xff]  ;;  %v236_v44 = vld [vmem:[%s1668_s3 + $0x2b8] sm:$0xff] }
  0x5d   : > { %719 = vadd.xlane.f32.xlu1 %v718_v34  ;;  %v475_v1 = vmul.f32 %v219_v49, %v219_v49  ;;  %v477_v2 = vmul.f32 %v221_v50, %v221_v50  ;;  %v478_v3 = vmul.f32 %v222_v51, %v222_v51  ;;  %v733_v5 = vadd.f32 %v732_v45, %v464_v42  ;;  %v241_v41 = vld [vmem:[%s1668_s3 + $0x2e0] sm:$0xff]  ;;  %v242_v42 = vld [vmem:[%s1668_s3 + $0x2e8] sm:$0xff]  ;;  %v243_v51 = vld [vmem:[%s1668_s3 + $0x2f0] sm:$0xff] }
  0x5e   : > { %v472_v6 = vmul.f32 %v216_v54, %v216_v54  ;;  %v742_v7 = vadd.f32 %v741_v59, %v471_v55  ;;  %v746_v8 = vadd.f32 %v474_v60, %v473_v56  ;;  %v479_v12 = vmul.f32 %v223_v61, %v223_v61  ;;  %v240_v55 = vld [vmem:[%s1668_s3 + $0x2d8] sm:$0xff]  ;;  %v247_v59 = vld [vmem:[%s1668_s3 + $0x310] sm:$0xff]  ;;  %v249_v60 = vld [vmem:[%s1668_s3 + $0x320] sm:$0xff] }
  0x5f   : > { %724 = vadd.xlane.f32.xlu0 %v723_v52  ;;  %v751_v13 = vadd.f32 %v478_v3, %v477_v2  ;;  %v481_v15 = vmul.f32 %v225_v62, %v225_v62  ;;  %v482_v16 = vmul.f32 %v226_v63, %v226_v63  ;;  %v738_v19 = vadd.f32 %v737_v58, %v468_v53  ;;  %v245_v52 = vld [vmem:[%s1668_s3 + $0x300] sm:$0xff]  ;;  %v246_v53 = vld [vmem:[%s1668_s3 + $0x308] sm:$0xff] }
  0x60   : > { %v476_v20 = vmul.f32 %v220_v0, %v220_v0  ;;  %v747_v21 = vadd.f32 %v746_v8, %v475_v1  ;;  %v483_v22 = vmul.f32 %v227_v4, %v227_v4  ;;  %v480_v24 = vmul.f32 %v224_v9, %v224_v9  ;;  %v244_v1 = vld [vmem:[%s1668_s3 + $0x2f8] sm:$0xff]  ;;  %v250_v2 = vld [vmem:[%s1668_s3 + $0x328] sm:$0xff]  ;;  %v253_v8 = vld [vmem:[%s1668_s3 + $0x340] sm:$0xff] }
  0x61   : > { %729 = vadd.xlane.f32.xlu1 %v728_v57  ;;  %v756_v25 = vadd.f32 %v482_v16, %v481_v15  ;;  %v485_v26 = vmul.f32 %v229_v10, %v229_v10  ;;  %v486_v27 = vmul.f32 %v230_v11, %v230_v11  ;;  %v743_v31 = vadd.f32 %v742_v7, %v472_v6  ;;  %v251_v7 = vld [vmem:[%s1668_s3 + $0x330] sm:$0xff]  ;;  %v254_v9 = vld [vmem:[%s1668_s3 + $0x348] sm:$0xff] }
  0x62   : > { %v484_v32 = vmul.f32 %v228_v14, %v228_v14  ;;  %v487_v34 = vmul.f32 %v231_v17, %v231_v17  ;;  %v489_v35 = vmul.f32 %v233_v18, %v233_v18  ;;  %v752_v37 = vadd.f32 %v751_v13, %v479_v12  ;;  %v248_v12 = vld [vmem:[%s1668_s3 + $0x318] sm:$0xff]  ;;  %v257_v18 = vld [vmem:[%s1668_s3 + $0x360] sm:$0xff] }
  0x63   : > { %734 = vadd.xlane.f32.xlu0 %v733_v5  ;;  %v757_v38 = vadd.f32 %v756_v25, %v483_v22  ;;  %v761_v39 = vadd.f32 %v486_v27, %v485_v26  ;;  %v490_v40 = vmul.f32 %v234_v23, %v234_v23  ;;  %v748_v43 = vadd.f32 %v747_v21, %v476_v20  ;;  %v252_v21 = vld [vmem:[%s1668_s3 + $0x338] sm:$0xff]  ;;  %v255_v23 = vld [vmem:[%s1668_s3 + $0x350] sm:$0xff] }
  0x64   : > { %v491_v45 = vmul.f32 %v235_v28, %v235_v28  ;;  %v493_v46 = vmul.f32 %v237_v29, %v237_v29  ;;  %v494_v47 = vmul.f32 %v238_v30, %v238_v30  ;;  %v488_v48 = vmul.f32 %v232_v33, %v232_v33  ;;  %v259_v30 = vld [vmem:[%s1668_s3 + $0x370] sm:$0xff] }
  0x65   : > { %739 = vadd.xlane.f32.xlu1 %v738_v19  ;;  %v766_v49 = vadd.f32 %v490_v40, %v489_v35  ;;  %v495_v50 = vmul.f32 %v239_v36, %v239_v36  ;;  %v762_v54 = vadd.f32 %v761_v39, %v487_v34  ;;  %v497_v57 = vmul.f32 %v241_v41, %v241_v41  ;;  %v258_v19 = vld [vmem:[%s1668_s3 + $0x368] sm:$0xff]  ;;  %v256_v40 = vld [vmem:[%s1668_s3 + $0x358] sm:$0xff] }
  0x66   : > { %v771_v56 = vadd.f32 %v494_v47, %v493_v46  ;;  %v498_v58 = vmul.f32 %v242_v42, %v242_v42  ;;  %v753_v61 = vadd.f32 %v752_v37, %v480_v24  ;;  %v758_v62 = vadd.f32 %v757_v38, %v484_v32  ;;  %v262_v32 = vld [vmem:[%s1668_s3 + $0x388] sm:$0xff]  ;;  %v265_v37 = vld [vmem:[%s1668_s3 + $0x3a0] sm:$0xff] }
  0x67   : > { %744 = vadd.xlane.f32.xlu0 %v743_v31  ;;  %v492_v63 = vmul.f32 %v236_v44, %v236_v44  ;;  %v767_v0 = vadd.f32 %v766_v49, %v491_v45  ;;  %v499_v3 = vmul.f32 %v243_v51, %v243_v51  ;;  %v501_v5 = vmul.f32 %v245_v52, %v245_v52  ;;  %v261_v31 = vld [vmem:[%s1668_s3 + $0x380] sm:$0xff]  ;;  %v260_v44 = vld [vmem:[%s1668_s3 + $0x378] sm:$0xff]  ;;  %v263_v52 = vld [vmem:[%s1668_s3 + $0x390] sm:$0xff] }
  0x68   : > { %v776_v4 = vadd.f32 %v498_v58, %v497_v57  ;;  %v502_v6 = vmul.f32 %v246_v53, %v246_v53  ;;  %v496_v10 = vmul.f32 %v240_v55, %v240_v55  ;;  %v772_v11 = vadd.f32 %v771_v56, %v495_v50  ;;  %v269_v49 = vld [vmem:[%s1668_s3 + $0x3c0] sm:$0xff]  ;;  %v270_v50 = vld [vmem:[%s1668_s3 + $0x3c8] sm:$0xff]  ;;  %v267_v56 = vld [vmem:[%s1668_s3 + $0x3b0] sm:$0xff] }
  0x69   : > { %749 = vadd.xlane.f32.xlu1 %v748_v43  ;;  %v503_v13 = vmul.f32 %v247_v59, %v247_v59  ;;  %v505_v14 = vmul.f32 %v249_v60, %v249_v60  ;;  %v763_v15 = vadd.f32 %v762_v54, %v488_v48  ;;  %v506_v17 = vmul.f32 %v250_v2, %v250_v2  ;;  %v266_v43 = vld [vmem:[%s1668_s3 + $0x3a8] sm:$0xff]  ;;  %v273_v58 = vld [vmem:[%s1668_s3 + $0x3e0] sm:$0xff] }
  0x6a   : > { %v781_v16 = vadd.f32 %v502_v6, %v501_v5  ;;  %v500_v20 = vmul.f32 %v244_v1, %v244_v1  ;;  %v507_v22 = vmul.f32 %v251_v7, %v251_v7  ;;  %v509_v24 = vmul.f32 %v253_v8, %v253_v8  ;;  %v274_v59 = vld [vmem:[%s1668_s3 + $0x3e8] sm:$0xff]  ;;  %v277_v6 = vld [vmem:[%s1668_s3 + $0x400] sm:$0xff]  ;;  %v268_v8 = vld [vmem:[%s1668_s3 + $0x3b8] sm:$0xff] }
  0x6b   : > { %754 = vadd.xlane.f32.xlu0 %v753_v61  ;;  %v510_v25 = vmul.f32 %v254_v9, %v254_v9  ;;  %v768_v26 = vadd.f32 %v767_v0, %v492_v63  ;;  %v777_v27 = vadd.f32 %v776_v4, %v499_v3  ;;  %v504_v28 = vmul.f32 %v248_v12, %v248_v12  ;;  %v264_v3 = vld [vmem:[%s1668_s3 + $0x398] sm:$0xff]  ;;  %v278_v7 = vld [vmem:[%s1668_s3 + $0x408] sm:$0xff] }
  0x6c   : > { %v786_v29 = vadd.f32 %v506_v17, %v505_v14  ;;  %v773_v33 = vadd.f32 %v772_v11, %v496_v10  ;;  %v782_v34 = vadd.f32 %v781_v16, %v503_v13  ;;  %v513_v35 = vmul.f32 %v257_v18, %v257_v18  ;;  %v281_v13 = vld [vmem:[%s1668_s3 + $0x420] sm:$0xff]  ;;  %v275_v16 = vld [vmem:[%s1668_s3 + $0x3f0] sm:$0xff]  ;;  %v282_v17 = vld [vmem:[%s1668_s3 + $0x428] sm:$0xff] }
  0x6d   : > { %759 = vadd.xlane.f32.xlu1 %v758_v62  ;;  %v514_v36 = vmul.f32 %v258_v19, %v258_v19  ;;  %v508_v38 = vmul.f32 %v252_v21, %v252_v21  ;;  %v511_v41 = vmul.f32 %v255_v23, %v255_v23  ;;  %v791_v42 = vadd.f32 %v510_v25, %v509_v24  ;;  %v271_v62 = vld [vmem:[%s1668_s3 + $0x3d0] sm:$0xff] }
  0x6e   : > { %v787_v39 = vadd.f32 %v786_v29, %v507_v22  ;;  %v515_v45 = vmul.f32 %v259_v30, %v259_v30  ;;  %v517_v47 = vmul.f32 %v261_v31, %v261_v31  ;;  %v518_v48 = vmul.f32 %v262_v32, %v262_v32  ;;  %v279_v21 = vld [vmem:[%s1668_s3 + $0x410] sm:$0xff]  ;;  %v285_v29 = vld [vmem:[%s1668_s3 + $0x440] sm:$0xff]  ;;  %v286_v30 = vld [vmem:[%s1668_s3 + $0x448] sm:$0xff] }
  0x6f   : > { %764 = vadd.xlane.f32.xlu0 %v763_v15  ;;  %v796_v46 = vadd.f32 %v514_v36, %v513_v35  ;;  %v778_v51 = vadd.f32 %v777_v27, %v500_v20  ;;  %v521_v53 = vmul.f32 %v265_v37, %v265_v37  ;;  %v783_v54 = vadd.f32 %v782_v34, %v504_v28  ;;  %v272_v20 = vld [vmem:[%s1668_s3 + $0x3d8] sm:$0xff]  ;;  %v283_v27 = vld [vmem:[%s1668_s3 + $0x430] sm:$0xff]  ;;  %v289_v35 = vld [vmem:[%s1668_s3 + $0x460] sm:$0xff] }
  0x70   : > { %v512_v55 = vmul.f32 %v256_v40, %v256_v40  ;;  %v522_v57 = vmul.f32 %v266_v43, %v266_v43  ;;  %v792_v60 = vadd.f32 %v791_v42, %v511_v41  ;;  %v516_v61 = vmul.f32 %v260_v44, %v260_v44  ;;  %v290_v36 = vld [vmem:[%s1668_s3 + $0x468] sm:$0xff]  ;;  %v280_v42 = vld [vmem:[%s1668_s3 + $0x418] sm:$0xff] }
  0x71   : > { %769 = vadd.xlane.f32.xlu1 %v768_v26  ;;  %v525_v63 = vmul.f32 %v269_v49, %v269_v49  ;;  %v526_v0 = vmul.f32 %v270_v50, %v270_v50  ;;  %v788_v1 = vadd.f32 %v787_v39, %v508_v38  ;;  %v797_v2 = vadd.f32 %v796_v46, %v515_v45  ;;  %v276_v39 = vld [vmem:[%s1668_s3 + $0x3f8] sm:$0xff]  ;;  %v287_v49 = vld [vmem:[%s1668_s3 + $0x450] sm:$0xff] }
  0x72   : > { %v519_v4 = vmul.f32 %v263_v52, %v263_v52  ;;  %v801_v5 = vadd.f32 %v518_v48, %v517_v47  ;;  %v523_v9 = vmul.f32 %v267_v56, %v267_v56  ;;  %v806_v10 = vadd.f32 %v522_v57, %v521_v53  ;;  %v284_v43 = vld [vmem:[%s1668_s3 + $0x438] sm:$0xff]  ;;  %v293_v56 = vld [vmem:[%s1668_s3 + $0x480] sm:$0xff]  ;;  %v294_v57 = vld [vmem:[%s1668_s3 + $0x488] sm:$0xff] }
  0x73   : > { %774 = vadd.xlane.f32.xlu0 %v773_v33  ;;  %v529_v11 = vmul.f32 %v273_v58, %v273_v58  ;;  %v530_v12 = vmul.f32 %v274_v59, %v274_v59  ;;  %v527_v14 = vmul.f32 %v271_v62, %v271_v62  ;;  %v811_v15 = vadd.f32 %v526_v0, %v525_v63  ;;  %v298_v62 = vld [vmem:[%s1668_s3 + $0x4a8] sm:$0xff] }
  0x74   : > { %v793_v18 = vadd.f32 %v792_v60, %v512_v55  ;;  %v520_v19 = vmul.f32 %v264_v3, %v264_v3  ;;  %v533_v22 = vmul.f32 %v277_v6, %v277_v6  ;;  %v534_v23 = vmul.f32 %v278_v7, %v278_v7  ;;  %v291_v55 = vld [vmem:[%s1668_s3 + $0x470] sm:$0xff]  ;;  %v301_v3 = vld [vmem:[%s1668_s3 + $0x4c0] sm:$0xff]  ;;  %v292_v6 = vld [vmem:[%s1668_s3 + $0x478] sm:$0xff] }
  0x75   : > { %779 = vadd.xlane.f32.xlu1 %v778_v51  ;;  %v798_v24 = vadd.f32 %v797_v2, %v516_v61  ;;  %v802_v25 = vadd.f32 %v801_v5, %v519_v4  ;;  %v524_v26 = vmul.f32 %v268_v8, %v268_v8  ;;  %v537_v28 = vmul.f32 %v281_v13, %v281_v13  ;;  %v297_v61 = vld [vmem:[%s1668_s3 + $0x4a0] sm:$0xff]  ;;  %v302_v4 = vld [vmem:[%s1668_s3 + $0x4c8] sm:$0xff]  ;;  %v288_v5 = vld [vmem:[%s1668_s3 + $0x458] sm:$0xff] }
  0x76   : > { %v807_v31 = vadd.f32 %v806_v10, %v523_v9  ;;  %v531_v32 = vmul.f32 %v275_v16, %v275_v16  ;;  %v816_v33 = vadd.f32 %v530_v12, %v529_v11  ;;  %v538_v34 = vmul.f32 %v282_v17, %v282_v17  ;;  %v295_v12 = vld [vmem:[%s1668_s3 + $0x490] sm:$0xff] }
  0x77   : > { %784 = vadd.xlane.f32.xlu0 %v783_v54  ;;  %v528_v37 = vmul.f32 %v272_v20, %v272_v20  ;;  %v812_v38 = vadd.f32 %v811_v15, %v527_v14  ;;  %v535_v40 = vmul.f32 %v279_v21, %v279_v21  ;;  %v821_v41 = vadd.f32 %v534_v23, %v533_v22  ;;  %v299_v15 = vld [vmem:[%s1668_s3 + $0x4b0] sm:$0xff] }
  0x78   : > { %v539_v44 = vmul.f32 %v283_v27, %v283_v27  ;;  %v826_v45 = vadd.f32 %v538_v34, %v537_v28  ;;  %v541_v46 = vmul.f32 %v285_v29, %v285_v29  ;;  %v542_v47 = vmul.f32 %v286_v30, %v286_v30  ;;  %v300_v34 = vld [vmem:[%s1668_s3 + $0x4b8] sm:$0xff] }
  0x79   : > { %789 = vadd.xlane.f32.xlu1 %v788_v1  ;;  %v803_v48 = vadd.f32 %v802_v25, %v520_v19  ;;  %v545_v50 = vmul.f32 %v289_v35, %v289_v35  ;;  %v546_v51 = vmul.f32 %v290_v36, %v290_v36  ;;  %v808_v52 = vadd.f32 %v807_v31, %v524_v26  ;;  %v306_v19 = vld [vmem:[%s1668_s3 + $0x4e8] sm:$0xff]  ;;  %v309_v25 = vld [vmem:[%s1668_s3 + $0x500] sm:$0xff] }
  0x7a   : > { %v532_v53 = vmul.f32 %v276_v39, %v276_v39  ;;  %v817_v54 = vadd.f32 %v816_v33, %v531_v32  ;;  %v813_v58 = vadd.f32 %v812_v38, %v528_v37  ;;  %v536_v59 = vmul.f32 %v280_v42, %v280_v42  ;;  %v310_v26 = vld [vmem:[%s1668_s3 + $0x508] sm:$0xff]  ;;  %v313_v31 = vld [vmem:[%s1668_s3 + $0x520] sm:$0xff]  ;;  %v296_v33 = vld [vmem:[%s1668_s3 + $0x498] sm:$0xff] }
  0x7b   : > { %794 = vadd.xlane.f32.xlu0 %v793_v18  ;;  %v540_v60 = vmul.f32 %v284_v43, %v284_v43  ;;  %v822_v63 = vadd.f32 %v821_v41, %v535_v40  ;;  %v827_v0 = vadd.f32 %v826_v45, %v539_v44  ;;  %v543_v1 = vmul.f32 %v287_v49, %v287_v49  ;;  %v305_v18 = vld [vmem:[%s1668_s3 + $0x4e0] sm:$0xff]  ;;  %v314_v32 = vld [vmem:[%s1668_s3 + $0x528] sm:$0xff]  ;;  %v307_v41 = vld [vmem:[%s1668_s3 + $0x4f0] sm:$0xff] }
  0x7c   : > { %v831_v2 = vadd.f32 %v542_v47, %v541_v46  ;;  %v547_v7 = vmul.f32 %v291_v55, %v291_v55  ;;  %v836_v8 = vadd.f32 %v546_v51, %v545_v50  ;;  %v549_v9 = vmul.f32 %v293_v56, %v293_v56  ;;  %v304_v44 = vld [vmem:[%s1668_s3 + $0x4d8] sm:$0xff]  ;;  %v311_v45 = vld [vmem:[%s1668_s3 + $0x510] sm:$0xff] }
  0x7d   : > { %799 = vadd.xlane.f32.xlu1 %v798_v24  ;;  %v550_v10 = vmul.f32 %v294_v57, %v294_v57  ;;  %v818_v11 = vadd.f32 %v817_v54, %v532_v53  ;;  %v553_v13 = vmul.f32 %v297_v61, %v297_v61  ;;  %v554_v14 = vmul.f32 %v298_v62, %v298_v62  ;;  %v303_v24 = vld [vmem:[%s1668_s3 + $0x4d0] sm:$0xff]  ;;  %v317_v53 = vld [vmem:[%s1668_s3 + $0x540] sm:$0xff]  ;;  %v318_v54 = vld [vmem:[%s1668_s3 + $0x548] sm:$0xff] }
  0x7e   : > { %v557_v16 = vmul.f32 %v301_v3, %v301_v3  ;;  %v558_v17 = vmul.f32 %v302_v4, %v302_v4  ;;  %v823_v20 = vadd.f32 %v822_v63, %v536_v59  ;;  %v544_v21 = vmul.f32 %v288_v5, %v288_v5  ;;  %v321_v59 = vld [vmem:[%s1668_s3 + $0x560] sm:$0xff]  ;;  %v308_v63 = vld [vmem:[%s1668_s3 + $0x4f8] sm:$0xff] }
  0x7f   : > { %804 = vadd.xlane.f32.xlu0 %v803_v48  ;;  %v832_v22 = vadd.f32 %v831_v2, %v543_v1  ;;  %v548_v23 = vmul.f32 %v292_v6, %v292_v6  ;;  %v828_v27 = vadd.f32 %v827_v0, %v540_v60  ;;  %v837_v28 = vadd.f32 %v836_v8, %v547_v7  ;;  %v322_v60 = vld [vmem:[%s1668_s3 + $0x568] sm:$0xff]  ;;  %v312_v2 = vld [vmem:[%s1668_s3 + $0x518] sm:$0xff] }
  0x80   : > { %v551_v29 = vmul.f32 %v295_v12, %v295_v12  ;;  %v841_v30 = vadd.f32 %v550_v10, %v549_v9  ;;  %v555_v35 = vmul.f32 %v299_v15, %v299_v15  ;;  %v846_v36 = vadd.f32 %v554_v14, %v553_v13  ;;  %v316_v3 = vld [vmem:[%s1668_s3 + $0x538] sm:$0xff]  ;;  %v319_v9 = vld [vmem:[%s1668_s3 + $0x550] sm:$0xff] }
  0x81   : > { %809 = vadd.xlane.f32.xlu1 %v808_v52  ;;  %v561_v37 = vmul.f32 %v305_v18, %v305_v18  ;;  %v562_v38 = vmul.f32 %v306_v19, %v306_v19  ;;  %v559_v39 = vmul.f32 %v303_v24, %v303_v24  ;;  %v851_v40 = vadd.f32 %v558_v17, %v557_v16  ;;  %v315_v52 = vld [vmem:[%s1668_s3 + $0x530] sm:$0xff]  ;;  %v325_v16 = vld [vmem:[%s1668_s3 + $0x580] sm:$0xff]  ;;  %v326_v17 = vld [vmem:[%s1668_s3 + $0x588] sm:$0xff] }
  0x82   : > { %v565_v42 = vmul.f32 %v309_v25, %v309_v25  ;;  %v566_v43 = vmul.f32 %v310_v26, %v310_v26  ;;  %v569_v46 = vmul.f32 %v313_v31, %v313_v31  ;;  %v570_v47 = vmul.f32 %v314_v32, %v314_v32  ;;  %v323_v15 = vld [vmem:[%s1668_s3 + $0x570] sm:$0xff] }
  0x83   : > { %814 = vadd.xlane.f32.xlu0 %v813_v58  ;;  %v833_v48 = vadd.f32 %v832_v22, %v544_v21  ;;  %v552_v49 = vmul.f32 %v296_v33, %v296_v33  ;;  %v842_v50 = vadd.f32 %v841_v30, %v551_v29  ;;  %v556_v51 = vmul.f32 %v300_v34, %v300_v34  ;;  %v329_v21 = vld [vmem:[%s1668_s3 + $0x5a0] sm:$0xff]  ;;  %v330_v22 = vld [vmem:[%s1668_s3 + $0x5a8] sm:$0xff]  ;;  %v320_v29 = vld [vmem:[%s1668_s3 + $0x558] sm:$0xff] }
  0x84   : > { %v838_v55 = vadd.f32 %v837_v28, %v548_v23  ;;  %v847_v56 = vadd.f32 %v846_v36, %v555_v35  ;;  %v563_v57 = vmul.f32 %v307_v41, %v307_v41  ;;  %v856_v58 = vadd.f32 %v562_v38, %v561_v37  ;;  %v334_v28 = vld [vmem:[%s1668_s3 + $0x5c8] sm:$0xff]  ;;  %v324_v30 = vld [vmem:[%s1668_s3 + $0x578] sm:$0xff]  ;;  %v327_v36 = vld [vmem:[%s1668_s3 + $0x590] sm:$0xff] }
  0x85   : > { %819 = vadd.xlane.f32.xlu1 %v818_v11  ;;  %v560_v61 = vmul.f32 %v304_v44, %v304_v44  ;;  %v852_v62 = vadd.f32 %v851_v40, %v559_v39  ;;  %v567_v0 = vmul.f32 %v311_v45, %v311_v45  ;;  %v861_v1 = vadd.f32 %v566_v43, %v565_v42  ;;  %v331_v39 = vld [vmem:[%s1668_s3 + $0x5b0] sm:$0xff]  ;;  %v337_v42 = vld [vmem:[%s1668_s3 + $0x5e0] sm:$0xff]  ;;  %v338_v43 = vld [vmem:[%s1668_s3 + $0x5e8] sm:$0xff] }
  0x86   : > { %v571_v4 = vmul.f32 %v315_v52, %v315_v52  ;;  %v866_v5 = vadd.f32 %v570_v47, %v569_v46  ;;  %v573_v6 = vmul.f32 %v317_v53, %v317_v53  ;;  %v574_v7 = vmul.f32 %v318_v54, %v318_v54 }
  0x87   : > { %824 = vadd.xlane.f32.xlu0 %v823_v20  ;;  %v843_v8 = vadd.f32 %v842_v50, %v552_v49  ;;  %v577_v10 = vmul.f32 %v321_v59, %v321_v59  ;;  %v578_v11 = vmul.f32 %v322_v60, %v322_v60  ;;  %v848_v12 = vadd.f32 %v847_v56, %v556_v51  ;;  %v341_v49 = vld [vmem:[%s1668_s3 + $0x600] sm:$0xff]  ;;  %v342_v50 = vld [vmem:[%s1668_s3 + $0x608] sm:$0xff] }
  0x88   : > { %v564_v13 = vmul.f32 %v308_v63, %v308_v63  ;;  %v857_v14 = vadd.f32 %v856_v58, %v563_v57  ;;  %v853_v18 = vadd.f32 %v852_v62, %v560_v61  ;;  %v568_v19 = vmul.f32 %v312_v2, %v312_v2  ;;  %v346_v56 = vld [vmem:[%s1668_s3 + $0x628] sm:$0xff]  ;;  %v328_v57 = vld [vmem:[%s1668_s3 + $0x598] sm:$0xff] }
  0x89   : > { %829 = vadd.xlane.f32.xlu1 %v828_v27  ;;  %v572_v20 = vmul.f32 %v316_v3, %v316_v3  ;;  %v862_v23 = vadd.f32 %v861_v1, %v567_v0  ;;  %v867_v24 = vadd.f32 %v866_v5, %v571_v4  ;;  %v575_v25 = vmul.f32 %v319_v9, %v319_v9  ;;  %v333_v27 = vld [vmem:[%s1668_s3 + $0x5c0] sm:$0xff]  ;;  %v332_v58 = vld [vmem:[%s1668_s3 + $0x5b8] sm:$0xff]  ;;  %v339_v1 = vld [vmem:[%s1668_s3 + $0x5f0] sm:$0xff] }
  0x8a   : > { %v871_v26 = vadd.f32 %v574_v7, %v573_v6  ;;  %v579_v31 = vmul.f32 %v323_v15, %v323_v15  ;;  %v876_v32 = vadd.f32 %v578_v11, %v577_v10  ;;  %v581_v33 = vmul.f32 %v325_v16, %v325_v16  ;;  %v336_v4 = vld [vmem:[%s1668_s3 + $0x5d8] sm:$0xff]  ;;  %v343_v5 = vld [vmem:[%s1668_s3 + $0x610] sm:$0xff] }
  0x8b   : > { %834 = vadd.xlane.f32.xlu0 %v833_v48  ;;  %v582_v34 = vmul.f32 %v326_v17, %v326_v17  ;;  %v858_v35 = vadd.f32 %v857_v14, %v564_v13  ;;  %v585_v37 = vmul.f32 %v329_v21, %v329_v21  ;;  %v586_v38 = vmul.f32 %v330_v22, %v330_v22  ;;  %v335_v48 = vld [vmem:[%s1668_s3 + $0x5d0] sm:$0xff]  ;;  %v349_v13 = vld [vmem:[%s1668_s3 + $0x640] sm:$0xff]  ;;  %v350_v14 = vld [vmem:[%s1668_s3 + $0x648] sm:$0xff] }
  0x8c   : > { %v589_v40 = vmul.f32 %v333_v27, %v333_v27  ;;  %v590_v41 = vmul.f32 %v334_v28, %v334_v28  ;;  %v863_v44 = vadd.f32 %v862_v23, %v568_v19  ;;  %v576_v45 = vmul.f32 %v320_v29, %v320_v29  ;;  %v353_v19 = vld [vmem:[%s1668_s3 + $0x660] sm:$0xff]  ;;  %v340_v23 = vld [vmem:[%s1668_s3 + $0x5f8] sm:$0xff] }
  0x8d   : > { %839 = vadd.xlane.f32.xlu1 %v838_v55  ;;  %v872_v46 = vadd.f32 %v871_v26, %v575_v25  ;;  %v580_v47 = vmul.f32 %v324_v30, %v324_v30  ;;  %v868_v51 = vadd.f32 %v867_v24, %v572_v20  ;;  %v877_v52 = vadd.f32 %v876_v32, %v579_v31  ;;  %v345_v55 = vld [vmem:[%s1668_s3 + $0x620] sm:$0xff]  ;;  %v354_v20 = vld [vmem:[%s1668_s3 + $0x668] sm:$0xff]  ;;  %v344_v26 = vld [vmem:[%s1668_s3 + $0x618] sm:$0xff] }
  0x8e   : > { %v583_v53 = vmul.f32 %v327_v36, %v327_v36  ;;  %v881_v54 = vadd.f32 %v582_v34, %v581_v33  ;;  %v587_v59 = vmul.f32 %v331_v39, %v331_v39  ;;  %v886_v60 = vadd.f32 %v586_v38, %v585_v37  ;;  %v348_v27 = vld [vmem:[%s1668_s3 + $0x638] sm:$0xff]  ;;  %v351_v33 = vld [vmem:[%s1668_s3 + $0x650] sm:$0xff] }
  0x8f   : > { %844 = vadd.xlane.f32.xlu0 %v843_v8  ;;  %v593_v61 = vmul.f32 %v337_v42, %v337_v42  ;;  %v594_v62 = vmul.f32 %v338_v43, %v338_v43  ;;  %v591_v63 = vmul.f32 %v335_v48, %v335_v48  ;;  %v891_v0 = vadd.f32 %v590_v41, %v589_v40  ;;  %v355_v39 = vld [vmem:[%s1668_s3 + $0x670] sm:$0xff]  ;;  %v357_v40 = vld [vmem:[%s1668_s3 + $0x680] sm:$0xff]  ;;  %v358_v41 = vld [vmem:[%s1668_s3 + $0x688] sm:$0xff] }
  0x90   : > { %v597_v2 = vmul.f32 %v341_v49, %v341_v49  ;;  %v598_v3 = vmul.f32 %v342_v50, %v342_v50  ;;  %v601_v6 = vmul.f32 %v345_v55, %v345_v55  ;;  %v602_v7 = vmul.f32 %v346_v56, %v346_v56 }
  0x91   : > { %849 = vadd.xlane.f32.xlu1 %v848_v12  ;;  %v873_v8 = vadd.f32 %v872_v46, %v576_v45  ;;  %v584_v9 = vmul.f32 %v328_v57, %v328_v57  ;;  %v882_v10 = vadd.f32 %v881_v54, %v583_v53  ;;  %v588_v11 = vmul.f32 %v332_v58, %v332_v58  ;;  %v347_v12 = vld [vmem:[%s1668_s3 + $0x630] sm:$0xff]  ;;  %v361_v45 = vld [vmem:[%s1668_s3 + $0x6a0] sm:$0xff]  ;;  %v362_v46 = vld [vmem:[%s1668_s3 + $0x6a8] sm:$0xff] }
  0x92   : > { %v878_v15 = vadd.f32 %v877_v52, %v580_v47  ;;  %v887_v16 = vadd.f32 %v886_v60, %v587_v59  ;;  %v595_v17 = vmul.f32 %v339_v1, %v339_v1  ;;  %v592_v21 = vmul.f32 %v336_v4, %v336_v4  ;;  %v366_v52 = vld [vmem:[%s1668_s3 + $0x6c8] sm:$0xff]  ;;  %v352_v53 = vld [vmem:[%s1668_s3 + $0x658] sm:$0xff]  ;;  %v359_v60 = vld [vmem:[%s1668_s3 + $0x690] sm:$0xff] }
  0x93   : > { %854 = vadd.xlane.f32.xlu0 %v853_v18  ;;  %v896_v18 = vadd.f32 %v594_v62, %v593_v61  ;;  %v892_v22 = vadd.f32 %v891_v0, %v591_v63  ;;  %v599_v24 = vmul.f32 %v343_v5, %v343_v5  ;;  %v901_v25 = vadd.f32 %v598_v3, %v597_v2  ;;  %v356_v54 = vld [vmem:[%s1668_s3 + $0x678] sm:$0xff]  ;;  %v363_v63 = vld [vmem:[%s1668_s3 + $0x6b0] sm:$0xff]  ;;  %v369_v2 = vld [vmem:[%s1668_s3 + $0x6e0] sm:$0xff] }
  0x94   : > { %v603_v28 = vmul.f32 %v347_v12, %v347_v12  ;;  %v906_v29 = vadd.f32 %v602_v7, %v601_v6  ;;  %v605_v30 = vmul.f32 %v349_v13, %v349_v13  ;;  %v606_v31 = vmul.f32 %v350_v14, %v350_v14  ;;  %v370_v3 = vld [vmem:[%s1668_s3 + $0x6e8] sm:$0xff] }
  0x95   : > { %859 = vadd.xlane.f32.xlu1 %v858_v35  ;;  %v883_v32 = vadd.f32 %v882_v10, %v584_v9  ;;  %v609_v34 = vmul.f32 %v353_v19, %v353_v19  ;;  %v610_v35 = vmul.f32 %v354_v20, %v354_v20  ;;  %v888_v36 = vadd.f32 %v887_v16, %v588_v11  ;;  %v373_v9 = vld [vmem:[%s1668_s3 + $0x700] sm:$0xff]  ;;  %v374_v10 = vld [vmem:[%s1668_s3 + $0x708] sm:$0xff] }
  0x96   : > { %v596_v37 = vmul.f32 %v340_v23, %v340_v23  ;;  %v897_v38 = vadd.f32 %v896_v18, %v595_v17  ;;  %v893_v42 = vadd.f32 %v892_v22, %v592_v21  ;;  %v600_v43 = vmul.f32 %v344_v26, %v344_v26  ;;  %v378_v16 = vld [vmem:[%s1668_s3 + $0x728] sm:$0xff]  ;;  %v360_v17 = vld [vmem:[%s1668_s3 + $0x698] sm:$0xff] }
  0x97   : > { %864 = vadd.xlane.f32.xlu0 %v863_v44  ;;  %v604_v44 = vmul.f32 %v348_v27, %v348_v27  ;;  %v902_v47 = vadd.f32 %v901_v25, %v599_v24  ;;  %v907_v48 = vadd.f32 %v906_v29, %v603_v28  ;;  %v607_v49 = vmul.f32 %v351_v33, %v351_v33  ;;  %v364_v18 = vld [vmem:[%s1668_s3 + $0x6b8] sm:$0xff]  ;;  %v371_v25 = vld [vmem:[%s1668_s3 + $0x6f0] sm:$0xff] }
  0x98   : > { %v911_v50 = vadd.f32 %v606_v31, %v605_v30  ;;  %v611_v55 = vmul.f32 %v355_v39, %v355_v39  ;;  %v916_v56 = vadd.f32 %v610_v35, %v609_v34  ;;  %v613_v57 = vmul.f32 %v357_v40, %v357_v40  ;;  %v368_v28 = vld [vmem:[%s1668_s3 + $0x6d8] sm:$0xff]  ;;  %v375_v29 = vld [vmem:[%s1668_s3 + $0x710] sm:$0xff] }
  0x99   : > { %869 = vadd.xlane.f32.xlu1 %v868_v51  ;;  %v365_v51 = vld [vmem:[%s1668_s3 + $0x6c0] sm:$0xff]  ;;  %v614_v58 = vmul.f32 %v358_v41, %v358_v41  ;;  %v898_v59 = vadd.f32 %v897_v38, %v596_v37  ;;  %v617_v61 = vmul.f32 %v361_v45, %v361_v45  ;;  %v618_v62 = vmul.f32 %v362_v46, %v362_v46  ;;  %v382_v38 = vld [vmem:[%s1668_s3 + $0x748] sm:$0xff] }
  0x9a   : > { %v621_v0 = vmul.f32 %v365_v51, %v365_v51  ;;  %v622_v1 = vmul.f32 %v366_v52, %v366_v52  ;;  %v903_v4 = vadd.f32 %v902_v47, %v600_v43  ;;  %v608_v5 = vmul.f32 %v352_v53, %v352_v53  ;;  %v381_v37 = vld [vmem:[%s1668_s3 + $0x740] sm:$0xff]  ;;  %v372_v47 = vld [vmem:[%s1668_s3 + $0x6f8] sm:$0xff] }
  0x9b   : > { %874 = vadd.xlane.f32.xlu0 %v873_v8  ;;  %v912_v6 = vadd.f32 %v911_v50, %v607_v49  ;;  %v612_v7 = vmul.f32 %v356_v54, %v356_v54  ;;  %v367_v8 = vld [vmem:[%s1668_s3 + $0x6d0] sm:$0xff]  ;;  %v908_v11 = vadd.f32 %v907_v48, %v604_v44  ;;  %v917_v12 = vadd.f32 %v916_v56, %v611_v55  ;;  %v385_v43 = vld [vmem:[%s1668_s3 + $0x760] sm:$0xff]  ;;  %v386_v44 = vld [vmem:[%s1668_s3 + $0x768] sm:$0xff] }
  0x9c   : > { %v615_v13 = vmul.f32 %v359_v60, %v359_v60  ;;  %v921_v14 = vadd.f32 %v614_v58, %v613_v57  ;;  %v619_v19 = vmul.f32 %v363_v63, %v363_v63  ;;  %v926_v20 = vadd.f32 %v618_v62, %v617_v61  ;;  %v376_v50 = vld [vmem:[%s1668_s3 + $0x718] sm:$0xff]  ;;  %v383_v57 = vld [vmem:[%s1668_s3 + $0x750] sm:$0xff] }
  0x9d   : > { %879 = vadd.xlane.f32.xlu1 %v878_v15  ;;  %v377_v15 = vld [vmem:[%s1668_s3 + $0x720] sm:$0xff]  ;;  %v625_v21 = vmul.f32 %v369_v2, %v369_v2  ;;  %v626_v22 = vmul.f32 %v370_v3, %v370_v3  ;;  %v623_v23 = vmul.f32 %v367_v8, %v367_v8  ;;  %v931_v24 = vadd.f32 %v622_v1, %v621_v0  ;;  %v380_v56 = vld [vmem:[%s1668_s3 + $0x738] sm:$0xff]  ;;  %v387_v63 = vld [vmem:[%s1668_s3 + $0x770] sm:$0xff] }
  0x9e   : > { %v629_v26 = vmul.f32 %v373_v9, %v373_v9  ;;  %v630_v27 = vmul.f32 %v374_v10, %v374_v10  ;;  %v633_v30 = vmul.f32 %v377_v15, %v377_v15  ;;  %v634_v31 = vmul.f32 %v378_v16, %v378_v16  ;;  %v389_v0 = vld [vmem:[%s1668_s3 + $0x780] sm:$0xff]  ;;  %v390_v1 = vld [vmem:[%s1668_s3 + $0x788] sm:$0xff]  ;;  %v384_v9 = vld [vmem:[%s1668_s3 + $0x758] sm:$0xff] }
  0x9f   : > { %884 = vadd.xlane.f32.xlu0 %v883_v32  ;;  %v913_v32 = vadd.f32 %v912_v6, %v608_v5  ;;  %v616_v33 = vmul.f32 %v360_v17, %v360_v17  ;;  %v922_v34 = vadd.f32 %v921_v14, %v615_v13  ;;  %v620_v35 = vmul.f32 %v364_v18, %v364_v18  ;;  %v393_v5 = vld [vmem:[%s1668_s3 + $0x7a0] sm:$0xff]  ;;  %v394_v6 = vld [vmem:[%s1668_s3 + $0x7a8] sm:$0xff]  ;;  %v391_v15 = vld [vmem:[%s1668_s3 + $0x790] sm:$0xff] }
  0xa0   : > { %v918_v39 = vadd.f32 %v917_v12, %v612_v7  ;;  %v927_v40 = vadd.f32 %v926_v20, %v619_v19  ;;  %v627_v41 = vmul.f32 %v371_v25, %v371_v25  ;;  %v624_v45 = vmul.f32 %v368_v28, %v368_v28  ;;  %v388_v12 = vld [vmem:[%s1668_s3 + $0x778] sm:$0xff]  ;;  %v395_v25 = vld [vmem:[%s1668_s3 + $0x7b0] sm:$0xff] }
  0xa1   : > { %889 = vadd.xlane.f32.xlu1 %v888_v36  ;;  %v379_v36 = vld [vmem:[%s1668_s3 + $0x730] sm:$0xff]  ;;  %v932_v46 = vadd.f32 %v931_v24, %v623_v23  ;;  %v631_v48 = vmul.f32 %v375_v29, %v375_v29  ;;  %v941_v49 = vadd.f32 %v630_v27, %v629_v26  ;;  %v946_v52 = vadd.f32 %v634_v31, %v633_v30  ;;  %v401_v26 = vld [vmem:[%s1668_s3 + $0x7e0] sm:$0xff]  ;;  %v402_v27 = vld [vmem:[%s1668_s3 + $0x7e8] sm:$0xff] }
  0xa2   : > { %v635_v51 = vmul.f32 %v379_v36, %v379_v36  ;;  %v637_v53 = vmul.f32 %v381_v37, %v381_v37  ;;  %v638_v54 = vmul.f32 %v382_v38, %v382_v38  ;;  %v923_v55 = vadd.f32 %v922_v34, %v616_v33  ;;  %v392_v33 = vld [vmem:[%s1668_s3 + $0x798] sm:$0xff] }
  0xa3   : > { %894 = vadd.xlane.f32.xlu0 %v893_v42  ;;  %v936_v42 = vadd.f32 %v626_v22, %v625_v21  ;;  %v641_v58 = vmul.f32 %v385_v43, %v385_v43  ;;  %v928_v60 = vadd.f32 %v927_v40, %v620_v35  ;;  %v628_v61 = vmul.f32 %v372_v47, %v372_v47  ;;  %v397_v21 = vld [vmem:[%s1668_s3 + $0x7c0] sm:$0xff]  ;;  %v398_v22 = vld [vmem:[%s1668_s3 + $0x7c8] sm:$0xff]  ;;  %v396_v37 = vld [vmem:[%s1668_s3 + $0x7b8] sm:$0xff] }
  0xa4   : > { %v933_v2 = vadd.f32 %v932_v46, %v624_v45  ;;  %v632_v3 = vmul.f32 %v376_v50, %v376_v50  ;;  %v636_v7 = vmul.f32 %v380_v56, %v380_v56  ;;  %v947_v8 = vadd.f32 %v946_v52, %v635_v51  ;;  %v399_v40 = vld [vmem:[%s1668_s3 + $0x7d0] sm:$0xff]  ;;  %v400_v52 = vld [vmem:[%s1668_s3 + $0x7d8] sm:$0xff] }
  0xa5   : > { %899 = vadd.xlane.f32.xlu1 %v898_v59  ;;  %v642_v59 = vmul.f32 %v386_v44, %v386_v44  ;;  %v937_v62 = vadd.f32 %v936_v42, %v627_v41  ;;  %v639_v10 = vmul.f32 %v383_v57, %v383_v57  ;;  %v643_v13 = vmul.f32 %v387_v63, %v387_v63  ;;  %v403_v43 = vld [vmem:[%s1668_s3 + $0x7f0] sm:$0xff] }
  0xa6   : > { %v645_v16 = vmul.f32 %v389_v0, %v389_v0  ;;  %v646_v17 = vmul.f32 %v390_v1, %v390_v1  ;;  %v649_v19 = vmul.f32 %v393_v5, %v393_v5  ;;  %v650_v20 = vmul.f32 %v394_v6, %v394_v6 }
  0xa7   : > { %904 = vadd.xlane.f32.xlu0 %v903_v4  ;;  %v942_v4 = vadd.f32 %v941_v49, %v631_v48  ;;  %v956_v14 = vadd.f32 %v642_v59, %v641_v58  ;;  %v938_v18 = vadd.f32 %v937_v62, %v628_v61  ;;  %v640_v24 = vmul.f32 %v384_v9, %v384_v9 }
  0xa8   : > { %v948_v28 = vadd.f32 %v947_v8, %v636_v7  ;;  %v644_v30 = vmul.f32 %v388_v12, %v388_v12  ;;  %v647_v31 = vmul.f32 %v391_v15, %v391_v15  ;;  %v961_v34 = vadd.f32 %v646_v17, %v645_v16 }
  0xa9   : > { %909 = vadd.xlane.f32.xlu1 %v908_v11  ;;  %v951_v11 = vadd.f32 %v638_v54, %v637_v53  ;;  %v943_v23 = vadd.f32 %v942_v4, %v632_v3  ;;  %v653_v35 = vmul.f32 %v397_v21, %v397_v21  ;;  %v654_v36 = vmul.f32 %v398_v22, %v398_v22 }
  0xaa   : > { %v651_v38 = vmul.f32 %v395_v25, %v395_v25  ;;  %v657_v41 = vmul.f32 %v401_v26, %v401_v26  ;;  %v658_v42 = vmul.f32 %v402_v27, %v402_v27  ;;  %v648_v45 = vmul.f32 %v392_v33, %v392_v33 }
  0xab   : > { %914 = vadd.xlane.f32.xlu0 %v913_v32  ;;  %v952_v29 = vadd.f32 %v951_v11, %v639_v10  ;;  %v957_v32 = vadd.f32 %v956_v14, %v643_v13  ;;  %v962_v46 = vadd.f32 %v961_v34, %v647_v31  ;;  %v652_v47 = vmul.f32 %v396_v37, %v396_v37 }
  0xac   : > { %v655_v48 = vmul.f32 %v399_v40, %v399_v40  ;;  %v971_v49 = vadd.f32 %v654_v36, %v653_v35  ;;  %v659_v53 = vmul.f32 %v403_v43, %v403_v43  ;;  %v976_v54 = vadd.f32 %v658_v42, %v657_v41 }
  0xad   : > { %919 = vadd.xlane.f32.xlu1 %v918_v39  ;;  %v966_v39 = vadd.f32 %v650_v20, %v649_v19  ;;  %v953_v44 = vadd.f32 %v952_v29, %v640_v24  ;;  %v958_v50 = vadd.f32 %v957_v32, %v644_v30  ;;  %v963_v56 = vadd.f32 %v962_v46, %v648_v45 }
  0xae   : > { %v656_v57 = vmul.f32 %v400_v52, %v400_v52  ;;  %v972_v58 = vadd.f32 %v971_v49, %v655_v48  ;;  %v977_v61 = vadd.f32 %v976_v54, %v659_v53  ;;  %v982_v62 = vlaneseq }
  0xaf   : > { %924 = vadd.xlane.f32.xlu0 %v923_v55  ;;  %v967_v51 = vadd.f32 %v966_v39, %v651_v38  ;;  %v404_v55 = vld [vmem:[%s1668_s3 + $0x7f8] sm:$0xff] }
  0xb0   : > { %v973_v63 = vadd.f32 %v972_v58, %v656_v57  ;;  %v1931_v1 = vshrl.u32 %v982_v62, 7 }
  0xb1   : > { %929 = vadd.xlane.f32.xlu1 %v928_v60  ;;  %v968_v59 = vadd.f32 %v967_v51, %v652_v47  ;;  %v660_v60 = vmul.f32 %v404_v55, %v404_v55 }
  0xb2   : > { %v985_v3 = vadd.s32 16, %v1931_v1  ;;  %v984_v4 = vadd.s32 8, %v1931_v1  ;;  %v986_v6 = vadd.s32 24, %v1931_v1  ;;  %v987_v7 = vadd.s32 32, %v1931_v1 }
  0xb3   : > { %934 = vadd.xlane.f32.xlu0 %v933_v2  ;;  %v978_v0 = vadd.f32 %v977_v61, %v660_v60  ;;  %v1933_v2 = vstv %s1409_s16  ;;  %v988_v10 = vadd.s32 40, %v1931_v1  ;;  %v989_v11 = vadd.s32 48, %v1931_v1 }
  0xb4   : > { %v1048_v5 = vadd.s32 %v1933_v2, %v1931_v1  ;;  %v1050_v8 = vadd.s32 %v1933_v2, %v985_v3  ;;  %v1049_v9 = vadd.s32 %v1933_v2, %v984_v4  ;;  %v1051_v12 = vadd.s32 %v1933_v2, %v986_v6 }
  0xb5   : > { %939 = vadd.xlane.f32.xlu1 %v938_v18  ;;  %v990_v13 = vadd.s32 56, %v1931_v1  ;;  %v1016_v14 = vadd.s32 264, %v1931_v1  ;;  %v1017_v15 = vadd.s32 272, %v1931_v1  ;;  %v1018_v16 = vadd.s32 280, %v1931_v1 }
  0xb6   : > { %vm1112_vm0 = vcmp.lt.s32.totalorder %v1048_v5, 651  ;;  %v1019_v17 = vadd.s32 288, %v1931_v1  ;;  %v1020_v18 = vadd.s32 296, %v1931_v1  ;;  %v1021_v19 = vadd.s32 304, %v1931_v1 }
  0xb7   : > { %944 = vadd.xlane.f32.xlu0 %v943_v23  ;;  %v1052_v20 = vadd.s32 %v1933_v2, %v987_v7  ;;  %v1955_v21 = vadd.s32 %v1933_v2, %v1016_v14  ;;  %v1958_v22 = vadd.s32 %v1933_v2, %v1017_v15  ;;  %v1022_v23 = vadd.s32 312, %v1931_v1 }
  0xb8   : > { %v1962_v24 = vadd.s32 %v1933_v2, %v1018_v16  ;;  %v1965_v25 = vadd.s32 %v1933_v2, %v1019_v17  ;;  %v1968_v26 = vadd.s32 %v1933_v2, %v1020_v18  ;;  %v1971_v27 = vadd.s32 %v1933_v2, %v1021_v19 }
  0xb9   : > { %949 = vadd.xlane.f32.xlu1 %v948_v28  ;;  %v1053_v28 = vadd.s32 %v1933_v2, %v988_v10  ;;  %v1975_v29 = vadd.s32 %v1933_v2, %v989_v11  ;;  %v1978_v30 = vadd.s32 %v1933_v2, %v1022_v23  ;;  %v1023_v31 = vadd.s32 320, %v1931_v1 }
  0xba   : > { %vm1114_vm1 = vcmp.lt.s32.totalorder %v1050_v8, 651  ;;  %vm1113_vm2 = vcmp.lt.s32.totalorder %v1049_v9, 651  ;;  %v1982_v32 = vadd.s32 %v1933_v2, %v990_v13  ;;  %v991_v33 = vadd.s32 64, %v1931_v1 }
  0xbb   : > { %954 = vadd.xlane.f32.xlu0 %v953_v44  ;;  %vm1115_vm3 = vcmp.lt.s32.totalorder %v1051_v12, 651  ;;  %v1986_v35 = vadd.s32 %v1933_v2, %v1023_v31  ;;  %v1024_v36 = vadd.s32 328, %v1931_v1  ;;  %v1025_v37 = vadd.s32 336, %v1931_v1 }
  0xbc   : > { %vm1116_vm4 = vcmp.lt.s32.totalorder %v1052_v20, 651  ;;  %v1026_v39 = vadd.s32 344, %v1931_v1  ;;  %v1027_v40 = vadd.s32 352, %v1931_v1  ;;  %v1028_v41 = vadd.s32 360, %v1931_v1 }
  0xbd   : > { %959 = vadd.xlane.f32.xlu1 %v958_v50  ;;  %vm1117_vm5 = vcmp.lt.s32.totalorder %v1053_v28, 651  ;;  %vm1118_vm6 = vcmp.lt.s32.totalorder %v1975_v29, 651  ;;  %v1995_v42 = vadd.s32 %v1933_v2, %v1024_v36  ;;  %v1998_v43 = vadd.s32 %v1933_v2, %v1025_v37 }
  0xbe   : > { %v2001_v44 = vadd.s32 %v1933_v2, %v1026_v39  ;;  %v2004_v45 = vadd.s32 %v1933_v2, %v1027_v40  ;;  %v2007_v46 = vadd.s32 %v1933_v2, %v1028_v41  ;;  %v1029_v47 = vadd.s32 368, %v1931_v1 }
  0xbf   : > { %964 = vadd.xlane.f32.xlu0 %v963_v56  ;;  %vm1119_vm7 = vcmp.lt.s32.totalorder %v1982_v32, 651  ;;  %v1056_v49 = vadd.s32 %v1933_v2, %v991_v33  ;;  %v1030_v50 = vadd.s32 376, %v1931_v1  ;;  %v1031_v51 = vadd.s32 384, %v1931_v1 }
  0xc0   : > { %v992_v56 = vadd.s32 72, %v1931_v1  ;;  %v1032_v62 = vadd.s32 392, %v1931_v1  ;;  %v993_v5 = vadd.s32 80, %v1931_v1  ;;  %v994_v6 = vadd.s32 88, %v1931_v1 }
  0xc1   : > { %969 = vadd.xlane.f32.xlu1 %v968_v59  ;;  %v2020_v59 = vadd.s32 %v1933_v2, %v1029_v47  ;;  %v2023_v60 = vadd.s32 %v1933_v2, %v1030_v50  ;;  %v2026_v61 = vadd.s32 %v1933_v2, %v1031_v51  ;;  %v1035_v7 = vadd.s32 416, %v1931_v1 }
  0xc2   : > { %v995_v10 = vadd.s32 96, %v1931_v1  ;;  %v2037_v11 = vadd.s32 %v1933_v2, %v1032_v62  ;;  %v996_v14 = vadd.s32 104, %v1931_v1  ;;  %v997_v18 = vadd.s32 112, %v1931_v1 }
  0xc3   : > { %974 = vadd.xlane.f32.xlu0 %v973_v63  ;;  %v1033_v63 = vadd.s32 400, %v1931_v1  ;;  %v2047_v16 = vadd.s32 %v1933_v2, %v1035_v7  ;;  %v1036_v19 = vadd.s32 424, %v1931_v1  ;;  %v1037_v20 = vadd.s32 432, %v1931_v1 }
  0xc4   : > { %vm1120_vm8 = vcmp.lt.s32.totalorder %v1056_v49, 651  ;;  %v1057_v33 = vadd.s32 %v1933_v2, %v992_v56  ;;  %v1039_v39 = vadd.s32 448, %v1931_v1  ;;  %v1058_v41 = vadd.s32 %v1933_v2, %v993_v5 }
  0xc5   : > { %979 = vadd.xlane.f32.xlu1 %v978_v0  ;;  %v1034_v0 = vadd.s32 408, %v1931_v1  ;;  %v2040_v12 = vadd.s32 %v1933_v2, %v1033_v63  ;;  %v2058_v28 = vadd.s32 %v1933_v2, %v1036_v19  ;;  %v1059_v50 = vadd.s32 %v1933_v2, %v994_v6 }
  0xc6   : > { %v2073_v51 = vadd.s32 %v1933_v2, %v1039_v39  ;;  %vm1121_vm9 = vcmp.lt.s32.totalorder %v1057_v33, 651  ;;  %v1042_v56 = vadd.s32 472, %v1931_v1  ;;  %v998_v32 = vadd.s32 120, %v1931_v1 }
  0xc7   : > { %v2044_v15 = vadd.s32 %v1933_v2, %v1034_v0  ;;  %v1043_v63 = vadd.s32 480, %v1931_v1  ;;  %vm1122_vm10 = vcmp.lt.s32.totalorder %v1058_v41, 651  ;;  %v1044_v49 = vadd.s32 488, %v1931_v1 }
  0xc8   : > { %v1045_v7 = vadd.s32 496, %v1931_v1  ;;  %vm1123_vm11 = vcmp.lt.s32.totalorder %v1059_v50, 651 }
  0xc9   : > { %v2091_v6 = vadd.s32 %v1933_v2, %v1043_v63 }
  0xd0   : > { %v665_v34 = vpop.xlane.xlu0 %664 }
  0xd1   : > { %v1176_v52 = vsel %vm1112_vm0, %v665_v34, 0.0  ;;  %v1038_v34 = vadd.s32 440, %v1931_v1 }
  0xd2   : > { %v675_v38 = vpop.xlane.xlu1 %674 }
  0xd3   : > { %v1178_v53 = vsel %vm1114_vm1, %v675_v38, 0.0  ;;  %v2061_v38 = vadd.s32 %v1933_v2, %v1037_v20  ;;  %v2066_v47 = vadd.s32 %v1933_v2, %v1038_v34  ;;  %v1062_v20 = vadd.s32 %v1933_v2, %v997_v18 }
  0xd4   : > { %v670_v48 = vpop.xlane.xlu0 %669  ;;  %v999_v34 = vadd.s32 128, %v1931_v1  ;;  %v1000_v18 = vadd.s32 136, %v1931_v1 }
  0xd5   : > { %v1177_v54 = vsel %vm1113_vm2, %v670_v48, 0.0  ;;  %v1040_v48 = vadd.s32 456, %v1931_v1  ;;  %vm1126_vm14 = vcmp.lt.s32.totalorder %v1062_v20, 651 }
  0xd6   : > { %v680_v55 = vpop.xlane.xlu1 %679  ;;  %v1240_v57 = vadd.f32 %v1177_v54, %v1176_v52  ;;  %v1041_v52 = vadd.s32 464, %v1931_v1  ;;  %v1064_v50 = vadd.s32 %v1933_v2, %v999_v34 }
  0xd7   : > { %v1179_v58 = vsel %vm1115_vm3, %v680_v55, 0.0  ;;  %v2077_v55 = vadd.s32 %v1933_v2, %v1040_v48 }
  0xd8   : > { %v1241_v3 = vadd.f32 %v1240_v57, %v1178_v53  ;;  %v685_v4 = vpop.xlane.xlu0 %684  ;;  %v2083_v62 = vadd.s32 %v1933_v2, %v1041_v52  ;;  %v1001_v52 = vadd.s32 144, %v1931_v1  ;;  %vm1128_vm0 = vcmp.lt.s32.totalorder %v1064_v50, 651 }
  0xd9   : > { %v1180_v8 = vsel %vm1116_vm4, %v685_v4, 0.0  ;;  %v2088_v4 = vadd.s32 %v1933_v2, %v1042_v56  ;;  %v1007_v50 = vadd.s32 192, %v1931_v1 }
  0xda   : > { %v690_v9 = vpop.xlane.xlu1 %689  ;;  %v1242_v13 = vadd.f32 %v1241_v3, %v1179_v58  ;;  %v1060_v3 = vadd.s32 %v1933_v2, %v995_v10 }
  0xdb   : > { %v1181_v17 = vsel %vm1117_vm5, %v690_v9, 0.0 }
  0xdc   : > { %v1243_v23 = vadd.f32 %v1242_v13, %v1180_v8  ;;  %v695_v31 = vpop.xlane.xlu0 %694  ;;  %v1061_v13 = vadd.s32 %v1933_v2, %v996_v14  ;;  %vm1124_vm12 = vcmp.lt.s32.totalorder %v1060_v3, 651  ;;  %v1066_v3 = vadd.s32 %v1933_v2, %v1001_v52 }
  0xdd   : > { %v1182_v36 = vsel %vm1118_vm6, %v695_v31, 0.0  ;;  %v2102_v31 = vadd.s32 %v1933_v2, %v1045_v7 }
  0xde   : > { %v700_v37 = vpop.xlane.xlu1 %699  ;;  %v1244_v40 = vadd.f32 %v1243_v23, %v1181_v17  ;;  %v1046_v17 = vadd.s32 504, %v1931_v1  ;;  %v2099_v23 = vadd.s32 %v1933_v2, %v1044_v49  ;;  %vm1125_vm13 = vcmp.lt.s32.totalorder %v1061_v13, 651 }
  0xdf   : > { %v1183_v29 = vsel %vm1119_vm7, %v700_v37, 0.0  ;;  %v1004_v13 = vadd.s32 168, %v1931_v1  ;;  %vm1130_vm2 = vcmp.lt.s32.totalorder %v1066_v3, 651  ;;  %v1009_v3 = vadd.s32 208, %v1931_v1 }
  0xe0   : > { %v1245_v53 = vadd.f32 %v1244_v40, %v1182_v36  ;;  %v705_v54 = vpop.xlane.xlu0 %704  ;;  %v2106_v36 = vadd.s32 %v1933_v2, %v1046_v17  ;;  %v1063_v40 = vadd.s32 %v1933_v2, %v998_v32 }
  0xe1   : > { %v1184_v57 = vsel %vm1120_vm8, %v705_v54, 0.0 }
  0xe2   : > { %v710_v58 = vpop.xlane.xlu1 %709  ;;  %v1246_v0 = vadd.f32 %v1245_v53, %v1183_v29  ;;  %vm1127_vm15 = vcmp.lt.s32.totalorder %v1063_v40, 651  ;;  %v1006_v40 = vadd.s32 184, %v1931_v1 }
  0xe3   : > { %v1185_v5 = vsel %vm1121_vm9, %v710_v58, 0.0  ;;  %v1002_v58 = vadd.s32 152, %v1931_v1 }
  0xe4   : > { %v1247_v8 = vadd.f32 %v1246_v0, %v1184_v57  ;;  %v715_v9 = vpop.xlane.xlu0 %714  ;;  %v1065_v57 = vadd.s32 %v1933_v2, %v1000_v18 }
  0xe5   : > { %v1186_v19 = vsel %vm1122_vm10, %v715_v9, 0.0  ;;  %v1067_v9 = vadd.s32 %v1933_v2, %v1002_v58 }
  0xe6   : > { %v720_v10 = vpop.xlane.xlu1 %719  ;;  %v1248_v33 = vadd.f32 %v1247_v8, %v1185_v5  ;;  %v1003_v5 = vadd.s32 160, %v1931_v1  ;;  %vm1129_vm1 = vcmp.lt.s32.totalorder %v1065_v57, 651  ;;  %v1008_v57 = vadd.s32 200, %v1931_v1 }
  0xe7   : > { %v1187_v14 = vsel %vm1123_vm11, %v720_v10, 0.0  ;;  %vm1131_vm3 = vcmp.lt.s32.totalorder %v1067_v9, 651  ;;  %v1010_v9 = vadd.s32 216, %v1931_v1 }
  0xe8   : > { %v1249_v37 = vadd.f32 %v1248_v33, %v1186_v19  ;;  %v725_v39 = vpop.xlane.xlu0 %724  ;;  %v1068_v20 = vadd.s32 %v1933_v2, %v1003_v5  ;;  %v1005_v33 = vadd.s32 176, %v1931_v1 }
  0xe9   : > { %v1188_v41 = vsel %vm1124_vm12, %v725_v39, 0.0  ;;  %v1069_v39 = vadd.s32 %v1933_v2, %v1004_v13 }
  0xea   : > { %v730_v48 = vpop.xlane.xlu1 %729  ;;  %v1250_v29 = vadd.f32 %v1249_v37, %v1187_v14  ;;  %vm1132_vm4 = vcmp.lt.s32.totalorder %v1068_v20, 651  ;;  %v1011_v20 = vadd.s32 224, %v1931_v1 }
  0xeb   : > { %v1189_v53 = vsel %vm1125_vm13, %v730_v48, 0.0  ;;  %vm1133_vm5 = vcmp.lt.s32.totalorder %v1069_v39, 651  ;;  %v1012_v39 = vadd.s32 232, %v1931_v1 }
  0xec   : > { %v1251_v54 = vadd.f32 %v1250_v29, %v1188_v41  ;;  %v735_v56 = vpop.xlane.xlu0 %734  ;;  %v1070_v29 = vadd.s32 %v1933_v2, %v1005_v33 }
  0xed   : > { %v1190_v63 = vsel %vm1126_vm14, %v735_v56, 0.0  ;;  %v1071_v56 = vadd.s32 %v1933_v2, %v1006_v40 }
  0xee   : > { %v740_v32 = vpop.xlane.xlu1 %739  ;;  %v1252_v0 = vadd.f32 %v1251_v54, %v1189_v53  ;;  %vm1134_vm6 = vcmp.lt.s32.totalorder %v1070_v29, 651  ;;  %v1013_v29 = vadd.s32 240, %v1931_v1 }
  0xef   : > { %v1191_v49 = vsel %vm1127_vm15, %v740_v32, 0.0  ;;  %vm1135_vm7 = vcmp.lt.s32.totalorder %v1071_v56, 651  ;;  %v1014_v56 = vadd.s32 248, %v1931_v1 }
  0xf0   : > { %v1253_v7 = vadd.f32 %v1252_v0, %v1190_v63  ;;  %v745_v8 = vpop.xlane.xlu0 %744  ;;  %v1072_v0 = vadd.s32 %v1933_v2, %v1007_v50 }
  0xf1   : > { %v1192_v17 = vsel %vm1128_vm0, %v745_v8, 0.0  ;;  %v1073_v8 = vadd.s32 %v1933_v2, %v1008_v57 }
  0xf2   : > { %v750_v19 = vpop.xlane.xlu1 %749  ;;  %v1254_v10 = vadd.f32 %v1253_v7, %v1191_v49  ;;  %vm1136_vm8 = vcmp.lt.s32.totalorder %v1072_v0, 651  ;;  %v1015_v0 = vadd.s32 256, %v1931_v1 }
  0xf3   : > { %v1193_v34 = vsel %vm1129_vm1, %v750_v19, 0.0  ;;  %vm1137_vm9 = vcmp.lt.s32.totalorder %v1073_v8, 651  ;;  %vm1145_vm1 = vcmp.lt.s32.totalorder %v1955_v21, 651 }
  0xf4   : > { %v1255_v14 = vadd.f32 %v1254_v10, %v1192_v17  ;;  %v755_v37 = vpop.xlane.xlu0 %754  ;;  %v1074_v10 = vadd.s32 %v1933_v2, %v1009_v3 }
  0xf5   : > { %v1194_v18 = vsel %vm1130_vm2, %v755_v37, 0.0  ;;  %v1075_v37 = vadd.s32 %v1933_v2, %v1010_v9  ;;  %vm1146_vm2 = vcmp.lt.s32.totalorder %v1958_v22, 651 }
  0xf6   : > { %v760_v41 = vpop.xlane.xlu1 %759  ;;  %v1256_v48 = vadd.f32 %v1255_v14, %v1193_v34  ;;  %vm1138_vm10 = vcmp.lt.s32.totalorder %v1074_v10, 651 }
  0xf7   : > { %v1195_v52 = vsel %vm1131_vm3, %v760_v41, 0.0  ;;  %vm1139_vm11 = vcmp.lt.s32.totalorder %v1075_v37, 651  ;;  %vm1147_vm3 = vcmp.lt.s32.totalorder %v1962_v24, 651 }
  0xf8   : > { %v1257_v53 = vadd.f32 %v1256_v48, %v1194_v18  ;;  %v765_v54 = vpop.xlane.xlu0 %764  ;;  %v1076_v48 = vadd.s32 %v1933_v2, %v1011_v20 }
  0xf9   : > { %v1196_v58 = vsel %vm1132_vm4, %v765_v54, 0.0  ;;  %v1077_v54 = vadd.s32 %v1933_v2, %v1012_v39  ;;  %vm1148_vm4 = vcmp.lt.s32.totalorder %v1965_v25, 651 }
  0xfa   : > { %v770_v63 = vpop.xlane.xlu1 %769  ;;  %v1258_v32 = vadd.f32 %v1257_v53, %v1195_v52  ;;  %vm1140_vm12 = vcmp.lt.s32.totalorder %v1076_v48, 651 }
  0xfb   : > { %v1197_v5 = vsel %vm1133_vm5, %v770_v63, 0.0  ;;  %vm1141_vm13 = vcmp.lt.s32.totalorder %v1077_v54, 651  ;;  %vm1149_vm5 = vcmp.lt.s32.totalorder %v1968_v26, 651 }
  0xfc   : > { %v1259_v49 = vadd.f32 %v1258_v32, %v1196_v58  ;;  %v775_v7 = vpop.xlane.xlu0 %774  ;;  %v1078_v32 = vadd.s32 %v1933_v2, %v1013_v29 }
  0xfd   : > { %v1198_v13 = vsel %vm1134_vm6, %v775_v7, 0.0  ;;  %v1079_v7 = vadd.s32 %v1933_v2, %v1014_v56  ;;  %vm1150_vm6 = vcmp.lt.s32.totalorder %v1971_v27, 651 }
  0xfe   : > { %v780_v17 = vpop.xlane.xlu1 %779  ;;  %v1260_v19 = vadd.f32 %v1259_v49, %v1197_v5  ;;  %vm1142_vm14 = vcmp.lt.s32.totalorder %v1078_v32, 651 }
  0xff   : > { %v1199_v33 = vsel %vm1135_vm7, %v780_v17, 0.0  ;;  %v1080_v17 = vadd.s32 %v1933_v2, %v1015_v0  ;;  %vm1143_vm15 = vcmp.lt.s32.totalorder %v1079_v7, 651  ;;  %vm1151_vm7 = vcmp.lt.s32.totalorder %v1978_v30, 651 }
 0x100   : > { %v1261_v34 = vadd.f32 %v1260_v19, %v1198_v13  ;;  %v785_v14 = vpop.xlane.xlu0 %784 }
 0x101   : > { %v1200_v40 = vsel %vm1136_vm8, %v785_v14, 0.0  ;;  %vm1144_vm0 = vcmp.lt.s32.totalorder %v1080_v17, 651  ;;  %vm1152_vm8 = vcmp.lt.s32.totalorder %v1986_v35, 651 }
 0x102   : > { %v790_v18 = vpop.xlane.xlu1 %789  ;;  %v1262_v41 = vadd.f32 %v1261_v34, %v1199_v33 }
 0x103   : > { %v1201_v50 = vsel %vm1137_vm9, %v790_v18, 0.0  ;;  %vm1153_vm9 = vcmp.lt.s32.totalorder %v1995_v42, 651 }
 0x104   : > { %v1263_v52 = vadd.f32 %v1262_v41, %v1200_v40  ;;  %v795_v53 = vpop.xlane.xlu0 %794 }
 0x105   : > { %v1202_v57 = vsel %vm1138_vm10, %v795_v53, 0.0  ;;  %vm1154_vm10 = vcmp.lt.s32.totalorder %v1998_v43, 651 }
 0x106   : > { %v800_v58 = vpop.xlane.xlu1 %799  ;;  %v1264_v63 = vadd.f32 %v1263_v52, %v1201_v50 }
 0x107   : > { %v1203_v3 = vsel %vm1139_vm11, %v800_v58, 0.0  ;;  %vm1155_vm11 = vcmp.lt.s32.totalorder %v2001_v44, 651 }
 0x108   : > { %v1265_v5 = vadd.f32 %v1264_v63, %v1202_v57  ;;  %v805_v49 = vpop.xlane.xlu0 %804 }
 0x109   : > { %v1204_v8 = vsel %vm1140_vm12, %v805_v49, 0.0  ;;  %vm1156_vm12 = vcmp.lt.s32.totalorder %v2004_v45, 651 }
 0x10a   : > { %v810_v9 = vpop.xlane.xlu1 %809  ;;  %v1266_v13 = vadd.f32 %v1265_v5, %v1203_v3 }
 0x10b   : > { %v1205_v19 = vsel %vm1141_vm13, %v810_v9, 0.0  ;;  %vm1157_vm13 = vcmp.lt.s32.totalorder %v2007_v46, 651 }
 0x10c   : > { %v1267_v10 = vadd.f32 %v1266_v13, %v1204_v8  ;;  %v815_v20 = vpop.xlane.xlu0 %814 }
 0x10d   : > { %v1206_v33 = vsel %vm1142_vm14, %v815_v20, 0.0  ;;  %vm1158_vm14 = vcmp.lt.s32.totalorder %v2020_v59, 651 }
 0x10e   : > { %v820_v34 = vpop.xlane.xlu1 %819  ;;  %v1268_v14 = vadd.f32 %v1267_v10, %v1205_v19 }
 0x10f   : > { %v1207_v1 = vsel %vm1143_vm15, %v820_v34, 0.0  ;;  %vm1159_vm15 = vcmp.lt.s32.totalorder %v2023_v60, 651 }
 0x110   : > { %v1269_v37 = vadd.f32 %v1268_v14, %v1206_v33  ;;  %v825_v39 = vpop.xlane.xlu0 %824 }
 0x111   : > { %v1208_v40 = vsel %vm1144_vm0, %v825_v39, 0.0  ;;  %vm1160_vm0 = vcmp.lt.s32.totalorder %v2026_v61, 651 }
 0x112   : > { %v830_v18 = vpop.xlane.xlu1 %829  ;;  %v1270_v41 = vadd.f32 %v1269_v37, %v1207_v1 }
 0x113   : > { %v1209_v48 = vsel %vm1145_vm1, %v830_v18, 0.0  ;;  %vm1161_vm1 = vcmp.lt.s32.totalorder %v2037_v11, 651 }
 0x114   : > { %v1271_v2 = vadd.f32 %v1270_v41, %v1208_v40  ;;  %v835_v29 = vpop.xlane.xlu0 %834 }
 0x115   : > { %v1210_v50 = vsel %vm1146_vm2, %v835_v29, 0.0  ;;  %vm1162_vm2 = vcmp.lt.s32.totalorder %v2040_v12, 651 }
 0x116   : > { %v840_v52 = vpop.xlane.xlu1 %839  ;;  %v1272_v53 = vadd.f32 %v1271_v2, %v1209_v48 }
 0x117   : > { %v1211_v54 = vsel %vm1147_vm3, %v840_v52, 0.0  ;;  %vm1163_vm3 = vcmp.lt.s32.totalorder %v2044_v15, 651 }
 0x118   : > { %v1273_v56 = vadd.f32 %v1272_v53, %v1210_v50  ;;  %v845_v57 = vpop.xlane.xlu0 %844 }
 0x119   : > { %v1212_v21 = vsel %vm1148_vm4, %v845_v57, 0.0  ;;  %vm1164_vm4 = vcmp.lt.s32.totalorder %v2047_v16, 651 }
 0x11a   : > { %v850_v58 = vpop.xlane.xlu1 %849  ;;  %v1274_v63 = vadd.f32 %v1273_v56, %v1211_v54 }
 0x11b   : > { %v1213_v22 = vsel %vm1149_vm5, %v850_v58, 0.0  ;;  %vm1165_vm5 = vcmp.lt.s32.totalorder %v2058_v28, 651 }
 0x11c   : > { %v1275_v32 = vadd.f32 %v1274_v63, %v1212_v21  ;;  %v855_v0 = vpop.xlane.xlu0 %854 }
 0x11d   : > { %v1214_v24 = vsel %vm1150_vm6, %v855_v0, 0.0  ;;  %vm1166_vm6 = vcmp.lt.s32.totalorder %v2061_v38, 651 }
 0x11e   : > { %v860_v3 = vpop.xlane.xlu1 %859  ;;  %v1276_v5 = vadd.f32 %v1275_v32, %v1213_v22 }
 0x11f   : > { %v1215_v25 = vsel %vm1151_vm7, %v860_v3, 0.0  ;;  %vm1167_vm7 = vcmp.lt.s32.totalorder %v2066_v47, 651 }
 0x120   : > { %v1277_v49 = vadd.f32 %v1276_v5, %v1214_v24  ;;  %v865_v7 = vpop.xlane.xlu0 %864 }
 0x121   : > { %v1216_v26 = vsel %vm1152_vm8, %v865_v7, 0.0  ;;  %vm1168_vm8 = vcmp.lt.s32.totalorder %v2073_v51, 651 }
 0x122   : > { %v870_v8 = vpop.xlane.xlu1 %869  ;;  %v1278_v9 = vadd.f32 %v1277_v49, %v1215_v25 }
 0x123   : > { %v1217_v27 = vsel %vm1153_vm9, %v870_v8, 0.0  ;;  %vm1169_vm9 = vcmp.lt.s32.totalorder %v2077_v55, 651 }
 0x124   : > { %v1279_v13 = vadd.f32 %v1278_v9, %v1216_v26  ;;  %v875_v17 = vpop.xlane.xlu0 %874 }
 0x125   : > { %v1218_v30 = vsel %vm1154_vm10, %v875_v17, 0.0  ;;  %vm1170_vm10 = vcmp.lt.s32.totalorder %v2083_v62, 651 }
 0x126   : > { %v880_v19 = vpop.xlane.xlu1 %879  ;;  %v1280_v10 = vadd.f32 %v1279_v13, %v1217_v27 }
 0x127   : > { %v1219_v35 = vsel %vm1155_vm11, %v880_v19, 0.0  ;;  %vm1171_vm11 = vcmp.lt.s32.totalorder %v2088_v4, 651 }
 0x128   : > { %v1281_v20 = vadd.f32 %v1280_v10, %v1218_v30  ;;  %v885_v33 = vpop.xlane.xlu0 %884 }
 0x129   : > { %v1220_v42 = vsel %vm1156_vm12, %v885_v33, 0.0  ;;  %vm1172_vm12 = vcmp.lt.s32.totalorder %v2091_v6, 651 }
 0x12a   : > { %v890_v34 = vpop.xlane.xlu1 %889  ;;  %v1282_v14 = vadd.f32 %v1281_v20, %v1219_v35 }
 0x12b   : > { %v1221_v43 = vsel %vm1157_vm13, %v890_v34, 0.0  ;;  %vm1173_vm13 = vcmp.lt.s32.totalorder %v2099_v23, 651 }
 0x12c   : > { %v1283_v1 = vadd.f32 %v1282_v14, %v1220_v42  ;;  %v895_v37 = vpop.xlane.xlu0 %894 }
 0x12d   : > { %v1222_v44 = vsel %vm1158_vm14, %v895_v37, 0.0  ;;  %vm1174_vm14 = vcmp.lt.s32.totalorder %v2102_v31, 651 }
 0x12e   : > { %v900_v39 = vpop.xlane.xlu1 %899  ;;  %v1284_v40 = vadd.f32 %v1283_v1, %v1221_v43 }
 0x12f   : > { %v1223_v45 = vsel %vm1159_vm15, %v900_v39, 0.0  ;;  %vm1175_vm15 = vcmp.lt.s32.totalorder %v2106_v36, 651 }
 0x130   : > { %v1285_v18 = vadd.f32 %v1284_v40, %v1222_v44  ;;  %v905_v41 = vpop.xlane.xlu0 %904 }
 0x131   : > { %v1224_v46 = vsel %vm1160_vm0, %v905_v41, 0.0 }
 0x132   : > { %v910_v48 = vpop.xlane.xlu1 %909  ;;  %v1286_v2 = vadd.f32 %v1285_v18, %v1223_v45 }
 0x133   : > { %v1225_v59 = vsel %vm1161_vm1, %v910_v48, 0.0 }
 0x134   : > { %v1287_v29 = vadd.f32 %v1286_v2, %v1224_v46  ;;  %v915_v50 = vpop.xlane.xlu0 %914 }
 0x135   : > { %v1226_v60 = vsel %vm1162_vm2, %v915_v50, 0.0 }
 0x136   : > { %v920_v52 = vpop.xlane.xlu1 %919  ;;  %v1288_v53 = vadd.f32 %v1287_v29, %v1225_v59 }
 0x137   : > { %v1227_v61 = vsel %vm1163_vm3, %v920_v52, 0.0 }
 0x138   : > { %v1289_v54 = vadd.f32 %v1288_v53, %v1226_v60  ;;  %v925_v56 = vpop.xlane.xlu0 %924 }
 0x139   : > { %v1228_v11 = vsel %vm1164_vm4, %v925_v56, 0.0 }
 0x13a   : > { %v930_v57 = vpop.xlane.xlu1 %929  ;;  %v1290_v21 = vadd.f32 %v1289_v54, %v1227_v61 }
 0x13b   : > { %v1229_v12 = vsel %vm1165_vm5, %v930_v57, 0.0 }
 0x13c   : > { %v1291_v58 = vadd.f32 %v1290_v21, %v1228_v11  ;;  %v935_v63 = vpop.xlane.xlu0 %934 }
 0x13d   : > { %v1230_v15 = vsel %vm1166_vm6, %v935_v63, 0.0 }
 0x13e   : > { %v940_v22 = vpop.xlane.xlu1 %939  ;;  %v1292_v32 = vadd.f32 %v1291_v58, %v1229_v12 }
 0x13f   : > { %v1231_v16 = vsel %vm1167_vm7, %v940_v22, 0.0 }
 0x140   : > { %v1293_v0 = vadd.f32 %v1292_v32, %v1230_v15  ;;  %v945_v24 = vpop.xlane.xlu0 %944 }
 0x141   : > { %v1232_v28 = vsel %vm1168_vm8, %v945_v24, 0.0 }
 0x142   : > { %v950_v3 = vpop.xlane.xlu1 %949  ;;  %v1294_v5 = vadd.f32 %v1293_v0, %v1231_v16 }
 0x143   : > { %v1233_v38 = vsel %vm1169_vm9, %v950_v3, 0.0 }
 0x144   : > { %v1295_v25 = vadd.f32 %v1294_v5, %v1232_v28  ;;  %v955_v49 = vpop.xlane.xlu0 %954 }
 0x145   : > { %v1234_v47 = vsel %vm1170_vm10, %v955_v49, 0.0 }
 0x146   : > { %v960_v7 = vpop.xlane.xlu1 %959  ;;  %v1296_v26 = vadd.f32 %v1295_v25, %v1233_v38 }
 0x147   : > { %v1235_v51 = vsel %vm1171_vm11, %v960_v7, 0.0 }
 0x148   : > { %v1297_v8 = vadd.f32 %v1296_v26, %v1234_v47  ;;  %v965_v9 = vpop.xlane.xlu0 %964 }
 0x149   : > { %v1236_v55 = vsel %vm1172_vm12, %v965_v9, 0.0 }
 0x14a   : > { %v970_v27 = vpop.xlane.xlu1 %969  ;;  %v1298_v13 = vadd.f32 %v1297_v8, %v1235_v51 }
 0x14b   : > { %v1237_v62 = vsel %vm1173_vm13, %v970_v27, 0.0 }
 0x14c   : > { %v1299_v17 = vadd.f32 %v1298_v13, %v1236_v55  ;;  %v975_v4 = vpop.xlane.xlu0 %974 }
 0x14d   : > { %v1238_v30 = vsel %vm1174_vm14, %v975_v4, 0.0 }
 0x14e   : > { %v980_v19 = vpop.xlane.xlu1 %979  ;;  %v1300_v6 = vadd.f32 %v1299_v17, %v1237_v62 }
 0x14f   : > { %v1239_v10 = vsel %vm1175_vm15, %v980_v19, 0.0 }
 0x150   : > { %v1301_v35 = vadd.f32 %v1300_v6, %v1238_v30 }
 0x152   : > { %v1302_v20 = vadd.f32 %v1301_v35, %v1239_v10 }
 0x154   : > { %v1303_v23 = vrot.slane %v1302_v20, 4 }
 0x156   : > { %v1304_v33 = vadd.f32 %v1303_v23, %v1302_v20 }
 0x158   : > { %v1305_v42 = vrot.slane %v1304_v33, 2 }
 0x15a   : > { %v1306_v34 = vadd.f32 %v1305_v42, %v1304_v33 }
 0x15c   : > { %v1307_v31 = vrot.slane %v1306_v34, 1 }
 0x15e   : > { %v1308_v14 = vadd.f32 %v1307_v31, %v1306_v34 }
 0x160   : > { %1309 = vst [vmem:[%s142_s30] sm:$0xff] %v1308_v14 }
 0x161   : > { %1498 = shalt.err (!%p1495_p12)
}
 0x162   : > { %s1499_s21 = scalar_lea.hbm %s1322_s11, 128  ;;  %s1503_s26 = scalar_lea.hbm %s2210_s1, 256 }
 0x163   : > { %p1500_p0 = scmp.ne.s32.totalorder %s1322_s11, %s1499_s21  ;;  %p1504_p2 = scmp.lt.s32.totalorder %s1322_s11, %s2210_s1 }
 0x164   : > { %p1505_p4 = scmp.lt.s32.totalorder %s1503_s26, %s1499_s21 }
 0x165   : > { %p1501_p1 = pnand %p1500_p0, %p1609_p9 }
 0x166   : > { %p1506_p5 = por %p1505_p4, %p1504_p2 }
 0x167   : > { %p1502_p3 = pneg %p1501_p1 }
 0x169   : > { %p1507_p6 = pnand %p1506_p5, %p1502_p3 }
 0x16b   : > { %1510 = shalt.err (!%p1507_p6)
}
 0x16c   : > { %1418 = dma.vmem_to_hbm [thread:$0]  (%p1609_p9), %s1325_s2, 128, %s1322_s11, %s1311_s13  }
 0x16d PF: > { %s1336_s29 = sand.u32 1, %s1537_s6   ;;  %p2215_p10 = scmp.ne.s32.totalorder %s2214_s18, 0 }
 0x16e   : > { %p2216_p11 = scmp.ge.s32.totalorder %s1549_s9, 2  ;;  %s1337_s3 = scalar_lea.sflag [#allocation4], %s1336_s29 }
 0x170   : > { %p1421_p13 = pnand %p2216_p11, %p2215_p10 }
 0x172   : > { %p1422_p7 = pneg %p1421_p13 }
 0x174   : > { %1532 = dma.done.wait (%p1422_p7), %s1337_s3, 128  }
 0x175   : > { %1534 = vsyncadd (%p1422_p7), %s1337_s3, 4294967168  ;;  %p14_p8 = scmp.ge.s32.totalorder %s1590_s12, 4   ;;  %s2217_s6 = smov %s1541_s7 }
 0x176   : > { %s2218_s7 = smov %s1545_s8  ;;  %s2219_s8 = smov %s1602_s15 }
 0x177   : > { %s2220_s9 = smov %s1590_s12  ;;  %16 = sbr.rel (!%p14_p8) target bundleno = 5 (0x5), region = 69 }
 0x17c   :  { %1342 = vsyncpa [#allocation3], 1 }
 0x17d   :  { %1344 = vsyncpa [#allocation3 + $0x1], 1 }
 0x17e   :  { %1345 = vsyncpa [#allocation4], 1 }
 0x17f   :  { %1347 = vsyncpa [#allocation4 + $0x1], 1 }

</bundles_post_ra>
